<compile_context>
chip_gen: v7x
topology: tpu7x:2x2x1
jax: 0.10.0
libtpu: 0.0.40
codegen_flags: <defaults>
</compile_context>

<pallas_src>
import functools

import jax
import jax.numpy as jnp
from jax.experimental import pallas as pl
from jax.experimental.pallas import tpu as pltpu


# ---------------------------------------------------------------------------
# Pallas kernel: one tile of TM output pixels, all (padded) output channels of one group.
# ---------------------------------------------------------------------------
def _volconv_kernel(p_ref, w1_ref, w2_ref, o_ref, q_ref, *, K, C):
    """Fused first + second order Volterra term as two MXU dots.

    p_ref  : (TM, K*C)     bf16 im2col patch tile (columns k*C + c, kernel-position major)
    w1_ref : (K*C, CoPad)  bf16 first-order weights
    w2_ref : (QW,  CoPad)  bf16 symmetric-folded second-order weights, QW = K*(K+1)/2 * C
    o_ref  : (TM, CoPad)   f32 output tile (lane-dense, CoPad % 128 == 0)
    q_ref  : (TM, QW)      bf16 VMEM scratch holding the pair-product features
    """
    p = p_ref[...]                                            # bf16, no upcast round-trip

    # ---- first-order term: one MXU dot straight from the patch tile --------
    acc = jnp.dot(p, w1_ref[...], preferred_element_type=jnp.float32)

    # ---- second-order features: symmetric pair products x_k * x_{k+d} ------
    # Built diagonal-offset-major (d = 0..K-1, k = 0..K-1-d) with one full-width VPU multiply
    # per d and stored straight into the bf16 scratch; every scratch column is (re)written each
    # iteration, so no padding columns and no garbage can reach the matmul.
    # bf16*bf16 is exact before the single rounding, so v5e's f32 VALU path stores identical bits.
    # TODO(synk): p[:, d*C:] is a lane-misaligned copy when C % 128 != 0; pltpu.roll would route
    # that shuffle to the XLU slot instead of masked lane shifts.
    off = 0
    for d in range(K):                                        # K small & static -> unrolled
        w = (K - d) * C
        q = p * p if d == 0 else p[:, :w] * p[:, d * C:]      # (TM, w) bf16
        q_ref[:, off:off + w] = q
        off += w

    # ---- second-order term: one MXU dot over the whole scratch -------------
    acc = acc + jnp.dot(q_ref[...], w2_ref[...], preferred_element_type=jnp.float32)
    o_ref[...] = acc.astype(o_ref.dtype)


# ---------------------------------------------------------------------------
# Host-side helpers
# ---------------------------------------------------------------------------
def _round_up(x, m):
    return ((x + m - 1) // m) * m


def _im2col(x, kh, kw, stride, pad):
    """x: (N, C, H, W) -> patches (N*OH*OW, K*C), columns position-major (k*C + c)."""
    N, C, H, W = x.shape
    xp = jnp.pad(x, ((0, 0), (0, 0), (pad, pad), (pad, pad)))
    OH = (H + 2 * pad - kh) // stride + 1
    OW = (W + 2 * pad - kw) // stride + 1
    cols = []
    for ki in range(kh):
        for kj in range(kw):
            cols.append(xp[:, :, ki:ki + stride * OH:stride, kj:kj + stride * OW:stride])
    p = jnp.stack(cols, axis=1)                                # (N, K, C, OH, OW)
    p = p.transpose(0, 3, 4, 1, 2).reshape(N * OH * OW, kh * kw * C)
    return p, OH, OW


def _fold_group_weights(w1g, w2g, K, Cg, Cog, copad, dtype):
    """Build the two weight matrices matching the kernel's feature layout.

    W1 rows:  k*Cg + c                              (first order)
    W2 rows:  diagonal-offset major: for d=0..K-1, k=0..K-1-d, c;  weight is
              W2[k,k] on the diagonal (d=0) and W2[k,k+d] + W2[k+d,k] for d>0,
              so the math equals the full sum_{p,q} x_p x_q W2[p,q].
    """
    # w1g: (Cog, Cg, kh, kw) -> (K*Cg, Cog)
    w1_mat = w1g.reshape(Cog, Cg, K).transpose(2, 1, 0).reshape(K * Cg, Cog)
    # w2g: (Cog, Cg, K, K) -> (K, K, Cg, Cog)
    w2_po = jnp.transpose(w2g, (2, 3, 1, 0))
    rows = []
    for d in range(K):
        if d == 0:
            idx = jnp.arange(K)
            blk = w2_po[idx, idx]                              # (K, Cg, Cog)
        else:
            idx = jnp.arange(K - d)
            blk = w2_po[idx, idx + d] + w2_po[idx + d, idx]    # (K-d, Cg, Cog)
        rows.append(blk.reshape((K - d) * Cg, Cog))
    w2_mat = jnp.concatenate(rows, axis=0)                     # (QW, Cog)
    pad = ((0, 0), (0, copad - Cog))                           # lane-dense output channels
    return (jnp.pad(w1_mat, pad).astype(dtype), jnp.pad(w2_mat, pad).astype(dtype))


def _prepare_inputs(x, w1, w2, kernel_size, stride, padding, groups,
                    compute_dtype=jnp.bfloat16):
    """im2col + weight folding, shared by the Pallas path and the matched reference."""
    # TODO(synk): patches are bf16 (activation quantization enters the quadratic term squared);
    # keep f32 patches on v6e/v7x if the accuracy budget demands it.
    N, Cin, H, W = x.shape
    kh, kw = kernel_size
    K = kh * kw
    Cout = w1.shape[0]
    Cg = Cin // groups
    Cog = Cout // groups
    copad = _round_up(Cog, 128)
    QW = (K * (K + 1) // 2) * Cg

    patches, OH, OW = _im2col(x, kh, kw, stride, padding)      # (M, K*Cin)
    M = patches.shape[0]
    pg = patches.reshape(M, K, groups, Cg).transpose(2, 0, 1, 3)
    pg = pg.reshape(groups, M, K * Cg).astype(compute_dtype)   # (G, M, K*Cg)

    w1_list, w2_list = [], []
    for g in range(groups):
        w1m, w2m = _fold_group_weights(w1[g * Cog:(g + 1) * Cog],
                                       w2[g * Cog:(g + 1) * Cog],
                                       K, Cg, Cog, copad, compute_dtype)
        w1_list.append(w1m)
        w2_list.append(w2m)
    w1_all = jnp.stack(w1_list, axis=0)                        # (G, K*Cg, copad)
    w2_all = jnp.stack(w2_list, axis=0)                        # (G, QW,   copad)

    meta = dict(N=N, OH=OH, OW=OW, M=M, K=K, Cg=Cg, Cog=Cog, Cout=Cout,
                copad=copad, QW=QW, groups=groups)
    return pg, w1_all, w2_all, meta


def _vmem_capacity_bytes():
    try:
        return int(pltpu.get_tpu_info().vmem_capacity_bytes)
    except Exception:
        return 64 << 20            # conservative fallback: v7x per-TensorCore VMEM


def _vmem_need_bytes(tm, KC, QW, copad):
    """True per-kernel VMEM need: double-buffered IO + single-buffered scratch/temps."""
    need = 2 * tm * KC * 2                 # patch tile (bf16, double buffered)
    need += 2 * tm * copad * 4             # output tile (f32, double buffered)
    need += 2 * (KC + QW) * copad * 2      # folded weights (bf16, double buffered)
    # TODO(synk): weights only change per group; pl.Buffered(1) or a one-shot manual DMA would
    # reclaim the second weight buffer (useful headroom on v7x's 64 MiB VMEM).
    need += tm * QW * 2                    # Q feature scratch (single)
    need += tm * copad * 4                 # f32 accumulator value
    need += tm * KC * 4                    # slack for slice/relayout temporaries
    return need


def _vmem_limit_bytes(tm, KC, QW, copad, vmem_cap):
    budget = int(1.25 * _vmem_need_bytes(tm, KC, QW, copad)) + (8 << 20)
    lo, hi = 16 << 20, max(16 << 20, (vmem_cap * 3) // 4)
    return int(max(lo, min(hi, budget)))


def _pick_tm(M, G, KC, QW, copad, vmem_cap, tm_max=512):
    """Largest M tile that fits ~half the generation's VMEM and leaves enough grid steps along
    M (>=4 when groups==1) so both v7x TensorCores get work on the 'parallel' axes."""
    tm = max(128, tm_max)
    min_steps = 4 if G == 1 else 2
    while tm > 128 and (_vmem_need_bytes(tm, KC, QW, copad) > vmem_cap // 2
                        or M < min_steps * tm):
        tm //= 2
    return tm


# ---------------------------------------------------------------------------
# Forward pass (Pallas)
# ---------------------------------------------------------------------------
def volconv_forward(x, w1, w2, kernel_size, stride, padding, groups, tm_max=512):
    """x: (N, Cin, H, W); w1: (Cout, Cin//g, kh, kw); w2: (Cout, Cin//g, K, K) -> NCHW output."""
    pg, w1_all, w2_all, meta = _prepare_inputs(x, w1, w2, kernel_size, stride, padding, groups)
    G, M, KC = pg.shape
    QW, copad = meta["QW"], meta["copad"]

    vmem_cap = _vmem_capacity_bytes()
    tm = _pick_tm(M, G, KC, QW, copad, vmem_cap, tm_max)
    Mpad = _round_up(M, tm)
    if Mpad != M:
        pg = jnp.pad(pg, ((0, 0), (0, Mpad - M), (0, 0)))

    kernel = functools.partial(_volconv_kernel, K=meta["K"], C=meta["Cg"])
    flops = 2 * G * Mpad * (KC + QW) * copad + G * Mpad * QW
    bytes_accessed = (pg.size * 2 + w1_all.size * 2 + w2_all.size * 2
                      + Mpad * G * copad * 4)

    # TODO(synk): when Cog << 128 and groups > 1, pack several groups' output channels into one
    # lane-dense weight block to fill the 256-wide MXU on v6e/v7x instead of padding per group.
    out = pl.pallas_call(
        kernel,
        out_shape=jax.ShapeDtypeStruct((Mpad, G * copad), jnp.float32),
        grid_spec=pltpu.PrefetchScalarGridSpec(
            num_scalar_prefetch=0,
            grid=(G, Mpad // tm),                              # one call covers all groups
            in_specs=[
                # patch tile; group dim squeezed out of the kernel view
                pl.BlockSpec((None, tm, KC), lambda g, i: (g, i, 0)),
                # folded weights, constant block index along the inner M axis (re-used)
                pl.BlockSpec((None, KC, copad), lambda g, i: (g, 0, 0)),
                pl.BlockSpec((None, QW, copad), lambda g, i: (g, 0, 0)),
            ],
            # lane-dense 2-D output (Mpad, G*copad): no post-kernel transpose pass needed
            out_specs=pl.BlockSpec((tm, copad), lambda g, i: (i, g)),
            scratch_shapes=[pltpu.VMEM((tm, QW), jnp.bfloat16)],
        ),
        compiler_params=pltpu.CompilerParams(
            dimension_semantics=("parallel", "parallel"),
            vmem_limit_bytes=_vmem_limit_bytes(tm, KC, QW, copad, vmem_cap),
        ),
        cost_estimate=pl.CostEstimate(
            flops=int(flops), transcendentals=0, bytes_accessed=int(bytes_accessed)),
    )(pg, w1_all, w2_all)

    y = out.reshape(Mpad, G, copad)[:M, :, :meta["Cog"]]       # strip M / channel padding
    y = y.reshape(M, meta["Cout"])
    y = y.reshape(meta["N"], meta["OH"], meta["OW"], meta["Cout"])
    return y.transpose(0, 3, 1, 2)                             # back to NCHW


# ---------------------------------------------------------------------------
# References
# ---------------------------------------------------------------------------
def volconv_reference_matched(x, w1, w2, kernel_size, stride, padding, groups):
    """Pure-JAX reference using the SAME bf16 rounding / feature construction as the kernel."""
    pg, w1_all, w2_all, meta = _prepare_inputs(x, w1, w2, kernel_size, stride, padding, groups)
    K, Cg = meta["K"], meta["Cg"]
    qs = []
    for d in range(K):
        w = (K - d) * Cg
        qs.append(pg * pg if d == 0 else pg[..., :w] * pg[..., d * Cg:])
    qfeat = jnp.concatenate(qs, axis=-1)                       # bf16 (G, M, QW)
    y = (jnp.einsum("gmf,gfo->gmo", pg.astype(jnp.float32),
                    w1_all.astype(jnp.float32), precision="highest")
         + jnp.einsum("gmf,gfo->gmo", qfeat.astype(jnp.float32),
                      w2_all.astype(jnp.float32), precision="highest"))
    y = y[:, :, :meta["Cog"]]
    y = jnp.transpose(y, (1, 0, 2)).reshape(meta["M"], meta["Cout"])
    y = y.reshape(meta["N"], meta["OH"], meta["OW"], meta["Cout"])
    return y.transpose(0, 3, 1, 2)


def volconv_reference(x, w1, w2, kernel_size, stride, padding, groups):
    """Full-f32 reference with the module's semantics (full K*K second-order term)."""
    N, Cin, H, W = x.shape
    kh, kw = kernel_size
    K = kh * kw
    Cout = w1.shape[0]
    Cg = Cin // groups
    Cog = Cout // groups
    outs = []
    OH = OW = None
    for g in range(groups):
        xg = x[:, g * Cg:(g + 1) * Cg]
        patches, OH, OW = _im2col(xg, kh, kw, stride, padding)
        P = patches.reshape(-1, K, Cg)
        w1g = w1[g * Cog:(g + 1) * Cog].reshape(Cog, Cg, K)
        w2g = w2[g * Cog:(g + 1) * Cog]
        y1 = jnp.einsum("mkc,ock->mo", P, w1g, precision="highest")
        y2 = jnp.einsum("mpc,mqc,ocpq->mo", P, P, w2g, precision="highest")
        outs.append(y1 + y2)
    y = jnp.concatenate(outs, axis=-1) if groups > 1 else outs[0]
    return y.reshape(N, OH, OW, Cout).transpose(0, 3, 1, 2)


# ---------------------------------------------------------------------------
if __name__ == "__main__":
    key = jax.random.PRNGKey(0)
    k1, k2, k3 = jax.random.split(key, 3)

    # Small shapes consistent with Volconv(in_chan, out_chan, kernel_size, stride, padding, groups)
    N, Cin, H, W = 2, 4, 16, 16
    Cout, ksz, stride, pad, groups = 8, (3, 3), 1, 1, 1
    K = ksz[0] * ksz[1]

    x = jax.random.normal(k1, (N, Cin, H, W), jnp.float32)
    # Deterministic synthetic parameters (no checkpoint load):
    #   w1 ~ nn.Conv2d weight (Cout, Cin//g, kh, kw), bias=False
    #   w2 ~ HO_conv second-order Volterra weight (Cout, Cin//g, K, K)
    w1 = 0.1 * jax.random.normal(k2, (Cout, Cin // groups, ksz[0], ksz[1]), jnp.float32)
    w2 = 0.05 * jax.random.normal(k3, (Cout, Cin // groups, K, K), jnp.float32)

    y = volconv_forward(x, w1, w2, ksz, stride, pad, groups)
    jax.block_until_ready(y)
    assert y.shape == (N, Cout, H, W), y.shape

    # Tight check vs a reference with identical bf16 operand rounding (only accumulation-order
    # differences remain).
    y_matched = volconv_reference_matched(x, w1, w2, ksz, stride, pad, groups)
    assert jnp.allclose(y, y_matched, atol=2e-3, rtol=2e-3), \
        float(jnp.max(jnp.abs(y - y_matched)))

    # Loose check vs the full-f32 module semantics (bounds the bf16 quantization error).
    y_f32 = volconv_reference(x, w1, w2, ksz, stride, pad, groups)
    assert jnp.allclose(y, y_f32, atol=5e-2, rtol=5e-2), \
        float(jnp.max(jnp.abs(y - y_f32)))

    print("KERNEL_OK")
</pallas_src>

<mosaic_0001>
module attributes {stable_mosaic.version = 11 : i64} {
  func.func @_volconv_kernel(%arg0: i32, %arg1: i32, %arg2: memref<1x128x36xbf16, #tpu.memory_space<vmem>>, %arg3: memref<1x36x128xbf16, #tpu.memory_space<vmem>>, %arg4: memref<1x180x128xbf16, #tpu.memory_space<vmem>>, %arg5: memref<128x128xf32, #tpu.memory_space<vmem>>, %arg6: memref<128x180xbf16, #tpu.memory_space<vmem>>) attributes {dimension_semantics = [#tpu.dimension_semantics<parallel>, #tpu.dimension_semantics<parallel>], iteration_bounds = array<i64: 1, 4>, scalar_prefetch = 0 : i64, scratch_operands = 1 : i64, tpu.core_type = #tpu.core_type<tc>, window_params = [{transform_indices = @transform_0, window_bounds = array<i64: 1, 128, 36>}, {transform_indices = @transform_1, window_bounds = array<i64: 1, 36, 128>}, {transform_indices = @transform_2, window_bounds = array<i64: 1, 180, 128>}, {transform_indices = @transform_3, window_bounds = array<i64: 128, 128>}]} {
    %c0 = arith.constant 0 : index
    %c0_0 = arith.constant 0 : index
    %c0_1 = arith.constant 0 : index
    %0 = vector.load %arg2[%c0, %c0_0, %c0_1] : memref<1x128x36xbf16, #tpu.memory_space<vmem>>, vector<1x128x36xbf16>
    %1 = vector.shape_cast %0 : vector<1x128x36xbf16> to vector<128x36xbf16>
    %c0_2 = arith.constant 0 : index
    %c0_3 = arith.constant 0 : index
    %c0_4 = arith.constant 0 : index
    %2 = vector.load %arg3[%c0_2, %c0_3, %c0_4] : memref<1x36x128xbf16, #tpu.memory_space<vmem>>, vector<1x36x128xbf16>
    %3 = vector.shape_cast %2 : vector<1x36x128xbf16> to vector<36x128xbf16>
    %cst = arith.constant dense<0.000000e+00> : vector<128x128xf32>
    %4 = tpu.matmul %1, %3, %cst {dimension_numbers = #tpu.dot_dimension_numbers<[1], [0], [0], [1], [0, 0, 1, 1], [], []>} : vector<128x36xbf16>, vector<36x128xbf16>, vector<128x128xf32> -> vector<128x128xf32>
    %5 = arith.mulf %1, %1 : vector<128x36xbf16>
    %c0_5 = arith.constant 0 : index
    %c0_6 = arith.constant 0 : index
    %6 = vector.load %arg6[%c0_5, %c0_6] : memref<128x180xbf16, #tpu.memory_space<vmem>>, vector<128x36xbf16>
    tpu.vector_store %arg6[%c0_5, %c0_6], %5 {strides = array<i32>} : memref<128x180xbf16, #tpu.memory_space<vmem>>, vector<128x36xbf16>,
    %7 = vector.extract_strided_slice %1 {offsets = [0, 0], sizes = [128, 32], strides = [1, 1]} : vector<128x36xbf16> to vector<128x32xbf16>
    %8 = vector.extract_strided_slice %1 {offsets = [0, 4], sizes = [128, 32], strides = [1, 1]} : vector<128x36xbf16> to vector<128x32xbf16>
    %9 = arith.mulf %7, %8 : vector<128x32xbf16>
    %c0_7 = arith.constant 0 : index
    %c36 = arith.constant 36 : index
    %10 = vector.load %arg6[%c0_7, %c36] : memref<128x180xbf16, #tpu.memory_space<vmem>>, vector<128x32xbf16>
    tpu.vector_store %arg6[%c0_7, %c36], %9 {strides = array<i32>} : memref<128x180xbf16, #tpu.memory_space<vmem>>, vector<128x32xbf16>,
    %11 = vector.extract_strided_slice %1 {offsets = [0, 0], sizes = [128, 28], strides = [1, 1]} : vector<128x36xbf16> to vector<128x28xbf16>
    %12 = vector.extract_strided_slice %1 {offsets = [0, 8], sizes = [128, 28], strides = [1, 1]} : vector<128x36xbf16> to vector<128x28xbf16>
    %13 = arith.mulf %11, %12 : vector<128x28xbf16>
    %c0_8 = arith.constant 0 : index
    %c68 = arith.constant 68 : index
    %14 = vector.load %arg6[%c0_8, %c68] : memref<128x180xbf16, #tpu.memory_space<vmem>>, vector<128x28xbf16>
    tpu.vector_store %arg6[%c0_8, %c68], %13 {strides = array<i32>} : memref<128x180xbf16, #tpu.memory_space<vmem>>, vector<128x28xbf16>,
    %15 = vector.extract_strided_slice %1 {offsets = [0, 0], sizes = [128, 24], strides = [1, 1]} : vector<128x36xbf16> to vector<128x24xbf16>
    %16 = vector.extract_strided_slice %1 {offsets = [0, 12], sizes = [128, 24], strides = [1, 1]} : vector<128x36xbf16> to vector<128x24xbf16>
    %17 = arith.mulf %15, %16 : vector<128x24xbf16>
    %c0_9 = arith.constant 0 : index
    %c96 = arith.constant 96 : index
    %18 = vector.load %arg6[%c0_9, %c96] : memref<128x180xbf16, #tpu.memory_space<vmem>>, vector<128x24xbf16>
    tpu.vector_store %arg6[%c0_9, %c96], %17 {strides = array<i32>} : memref<128x180xbf16, #tpu.memory_space<vmem>>, vector<128x24xbf16>,
    %19 = vector.extract_strided_slice %1 {offsets = [0, 0], sizes = [128, 20], strides = [1, 1]} : vector<128x36xbf16> to vector<128x20xbf16>
    %20 = vector.extract_strided_slice %1 {offsets = [0, 16], sizes = [128, 20], strides = [1, 1]} : vector<128x36xbf16> to vector<128x20xbf16>
    %21 = arith.mulf %19, %20 : vector<128x20xbf16>
    %c0_10 = arith.constant 0 : index
    %c120 = arith.constant 120 : index
    %22 = vector.load %arg6[%c0_10, %c120] : memref<128x180xbf16, #tpu.memory_space<vmem>>, vector<128x20xbf16>
    tpu.vector_store %arg6[%c0_10, %c120], %21 {strides = array<i32>} : memref<128x180xbf16, #tpu.memory_space<vmem>>, vector<128x20xbf16>,
    %23 = vector.extract_strided_slice %1 {offsets = [0, 0], sizes = [128, 16], strides = [1, 1]} : vector<128x36xbf16> to vector<128x16xbf16>
    %24 = vector.extract_strided_slice %1 {offsets = [0, 20], sizes = [128, 16], strides = [1, 1]} : vector<128x36xbf16> to vector<128x16xbf16>
    %25 = arith.mulf %23, %24 : vector<128x16xbf16>
    %c0_11 = arith.constant 0 : index
    %c140 = arith.constant 140 : index
    %26 = vector.load %arg6[%c0_11, %c140] : memref<128x180xbf16, #tpu.memory_space<vmem>>, vector<128x16xbf16>
    tpu.vector_store %arg6[%c0_11, %c140], %25 {strides = array<i32>} : memref<128x180xbf16, #tpu.memory_space<vmem>>, vector<128x16xbf16>,
    %27 = vector.extract_strided_slice %1 {offsets = [0, 0], sizes = [128, 12], strides = [1, 1]} : vector<128x36xbf16> to vector<128x12xbf16>
    %28 = vector.extract_strided_slice %1 {offsets = [0, 24], sizes = [128, 12], strides = [1, 1]} : vector<128x36xbf16> to vector<128x12xbf16>
    %29 = arith.mulf %27, %28 : vector<128x12xbf16>
    %c0_12 = arith.constant 0 : index
    %c156 = arith.constant 156 : index
    %30 = vector.load %arg6[%c0_12, %c156] : memref<128x180xbf16, #tpu.memory_space<vmem>>, vector<128x12xbf16>
    tpu.vector_store %arg6[%c0_12, %c156], %29 {strides = array<i32>} : memref<128x180xbf16, #tpu.memory_space<vmem>>, vector<128x12xbf16>,
    %31 = vector.extract_strided_slice %1 {offsets = [0, 0], sizes = [128, 8], strides = [1, 1]} : vector<128x36xbf16> to vector<128x8xbf16>
    %32 = vector.extract_strided_slice %1 {offsets = [0, 28], sizes = [128, 8], strides = [1, 1]} : vector<128x36xbf16> to vector<128x8xbf16>
    %33 = arith.mulf %31, %32 : vector<128x8xbf16>
    %c0_13 = arith.constant 0 : index
    %c168 = arith.constant 168 : index
    %34 = vector.load %arg6[%c0_13, %c168] : memref<128x180xbf16, #tpu.memory_space<vmem>>, vector<128x8xbf16>
    tpu.vector_store %arg6[%c0_13, %c168], %33 {strides = array<i32>} : memref<128x180xbf16, #tpu.memory_space<vmem>>, vector<128x8xbf16>,
    %35 = vector.extract_strided_slice %1 {offsets = [0, 0], sizes = [128, 4], strides = [1, 1]} : vector<128x36xbf16> to vector<128x4xbf16>
    %36 = vector.extract_strided_slice %1 {offsets = [0, 32], sizes = [128, 4], strides = [1, 1]} : vector<128x36xbf16> to vector<128x4xbf16>
    %37 = arith.mulf %35, %36 : vector<128x4xbf16>
    %c0_14 = arith.constant 0 : index
    %c176 = arith.constant 176 : index
    %38 = vector.load %arg6[%c0_14, %c176] : memref<128x180xbf16, #tpu.memory_space<vmem>>, vector<128x4xbf16>
    tpu.vector_store %arg6[%c0_14, %c176], %37 {strides = array<i32>} : memref<128x180xbf16, #tpu.memory_space<vmem>>, vector<128x4xbf16>,
    %c0_15 = arith.constant 0 : index
    %c0_16 = arith.constant 0 : index
    %39 = vector.load %arg6[%c0_15, %c0_16] : memref<128x180xbf16, #tpu.memory_space<vmem>>, vector<128x180xbf16>
    %c0_17 = arith.constant 0 : index
    %c0_18 = arith.constant 0 : index
    %c0_19 = arith.constant 0 : index
    %40 = vector.load %arg4[%c0_17, %c0_18, %c0_19] : memref<1x180x128xbf16, #tpu.memory_space<vmem>>, vector<1x180x128xbf16>
    %41 = vector.shape_cast %40 : vector<1x180x128xbf16> to vector<180x128xbf16>
    %cst_20 = arith.constant dense<0.000000e+00> : vector<128x128xf32>
    %42 = tpu.matmul %39, %41, %cst_20 {dimension_numbers = #tpu.dot_dimension_numbers<[1], [0], [0], [1], [0, 0, 1, 1], [], []>} : vector<128x180xbf16>, vector<180x128xbf16>, vector<128x128xf32> -> vector<128x128xf32>
    %43 = arith.addf %4, %42 : vector<128x128xf32>
    %c0_21 = arith.constant 0 : index
    %c0_22 = arith.constant 0 : index
    %44 = vector.load %arg5[%c0_21, %c0_22] : memref<128x128xf32, #tpu.memory_space<vmem>>, vector<128x128xf32>
    tpu.vector_store %arg5[%c0_21, %c0_22], %43 {strides = array<i32>} : memref<128x128xf32, #tpu.memory_space<vmem>>, vector<128x128xf32>,
    return
  }
  func.func @transform_0(%arg0: i32, %arg1: i32) -> (i32, i32, i32) {
    %c0_i32 = arith.constant 0 : i32
    %c0_i32_0 = arith.constant 0 : i32
    return %arg0, %arg1, %c0_i32 : i32, i32, i32
  }
  func.func @transform_1(%arg0: i32, %arg1: i32) -> (i32, i32, i32) {
    %c0_i32 = arith.constant 0 : i32
    %c0_i32_0 = arith.constant 0 : i32
    %c0_i32_1 = arith.constant 0 : i32
    return %arg0, %c0_i32, %c0_i32_0 : i32, i32, i32
  }
  func.func @transform_2(%arg0: i32, %arg1: i32) -> (i32, i32, i32) {
    %c0_i32 = arith.constant 0 : i32
    %c0_i32_0 = arith.constant 0 : i32
    %c0_i32_1 = arith.constant 0 : i32
    return %arg0, %c0_i32, %c0_i32_0 : i32, i32, i32
  }
  func.func @transform_3(%arg0: i32, %arg1: i32) -> (i32, i32) {
    %c0_i32 = arith.constant 0 : i32
    return %arg1, %arg0 : i32, i32
  }
}

</mosaic_0001>

<bundles_post_ra>
// kernel: tpu_custom_call.1
= control target key start
LH: loop header
LB: loop body
LE: loop exit
PB: predicated region body
PF: predicated region fallthrough
CT: control target
= control target key end

     0   :  { %8 = vsyncpa [#allocation4], 0  ;;  %s3601_s0 = inlined_call_operand.vmem [shape: bf16[1,512,36], index: 0, kind: input, shape index: {}]   ;;  %s3602_s1 = inlined_call_operand.vmem [shape: bf16[1,36,128], index: 1, kind: input, shape index: {}]   ;;  %s3603_s2 = inlined_call_operand.vmem [shape: bf16[1,180,128], index: 2, kind: input, shape index: {}]   ;;  %s3604_s3 = inlined_call_operand.hbm [shape: f32[512,128], index: 3, kind: output, shape index: {}]  }
   0x1   :  { %10 = vsyncpa [#allocation4 + $0x1], 0  ;;  %s2398_s12 = smov 0   ;;  %s2400_s13 = smov 0  }
   0x2   :  { %s2402_s14 = smov 0   ;;  %s2404_s15 = smov 0  }
   0x3   :  { %s2406_s16 = smov 0   ;;  %s2408_s17 = smov 0  }
   0x4 LB: > { %s1992_s18 = sadd.s32 4294967295, %s2358_s17   ;;  %s1993_s19 = sadd.s32 4294967294, %s2358_s17   ;;  %s2358_s17 = sphi %s2408_s17, %s16_s17   ;;  %s2354_s16 = sphi %s2406_s16, %s3698_s16   ;;  %s2350_s15 = sphi %s2404_s15, %s3697_s15   ;;  %s2346_s14 = sphi %s2402_s14, %s3696_s14   ;;  %s2342_s13 = sphi %s2400_s13, %s3695_s13   ;;  %s2338_s12 = sphi %s2398_s12, %s3694_s12  }
   0x5   : > { %s25_s20 = sadd.s32 1, %s2354_s16  ;;  %s117_s21 = sadd.s32 1, %s2346_s14 }
   0x6   : > { %p26_p0 = scmp.ge.s32.totalorder %s25_s20, 4  ;;  %p127_p1 = scmp.ne.s32.totalorder %s2346_s14, %s2342_s13 }
   0x7   : > { %p128_p2 = scmp.eq.s32.totalorder %s1992_s18, 3  ;;  %p133_p3 = scmp.ne.s32.totalorder %s2342_s13, %s2338_s12 }
   0x8   : > { %s3700_s20 = smov (%p26_p0, %s25_s20), 0  ;;  %p134_p5 = scmp.eq.s32.totalorder %s1993_s19, 3 }
   0x9   : > { %p2438_p4 = por %p128_p2, %p127_p1  ;;  %s112_s23 = ssub.s32 %s2354_s16, %s3700_s20 }
   0xa   : > { %p1998_p6 = scmp.ge.s32.totalorder %s2358_s17, 1  ;;  %p115_p7 = scmp.eq.s32.totalorder %s112_s23, 0 }
   0xb   : > { %p2445_p8 = por %p134_p5, %p133_p3  ;;  %p181_p9 = scmp.lt.s32.totalorder %s2358_s17, 5 }
   0xc   : > { %s2451_s25 = scalar_select %p115_p7, %s2346_s14, %s117_s21  }
   0xd   : > { %p182_p10 = pnand %p1998_p6, %p181_p9 }
   0xf   : > { %185 = sbr.rel (%p182_p10) target bundleno = 765 (0x2fd), region = 32 }
  0x16   : > { %s2000_s26 = sshll.u32 %s2350_s15, 4  ;;  %s2360_s4 = smov 112   ;;  %vm326_vm0 = vcmask 293888   ;;  %vm1589_vm1 = vcmask 1041408   ;;  %vm892_vm2 = vcmask 97280   ;;  %vm1036_vm3 = vcmask 228448  }
  0x17   : > { %p222_p11 = scmp.lt.s32.totalorder %s2000_s26, 63  ;;  %s2361_s5 = smov 108   ;;  %vm479_vm4 = vcmask 556320   ;;  %vm1173_vm5 = vcmask 326880   ;;  %vm616_vm6 = vcmask 785952   ;;  %vm1310_vm7 = vcmask 392512  }
  0x18   : > { %s2362_s6 = smov 124   ;;  %s2363_s7 = smov 104   ;;  %vm753_vm8 = vcmask 982784   ;;  %vm890_vm9 = vcmask 1048512   ;;  %vm1447_vm10 = vcmask 425344   ;;  %vm1564_vm11 = vcmask 424960  }
  0x19   : > { %s3702_s26 = smov (!%p222_p11, %s2000_s26), 63  ;;  %s2364_s8 = smov 120  }
  0x1a   : > { %s2001_s27 = sshll.u32 %s3702_s26, 2  ;;  %s2365_s9 = smov 100  }
  0x1b   : > { %s2457_s30 = scalar_lea.vmem %s3601_s0, %s2001_s27  ;;  %s2366_s10 = smov 116  }
  0x1c   : > { %v2460_v0 = vld [vmem:[%s2457_s30 + $0x30] sm:$0xf]  ;;  %v2463_v1 = vld [vmem:[%s2457_s30] sm:$0xf]  ;;  %v2470_v2 = vld [vmem:[%s2457_s30 + $0x34] sm:$0xf] }
  0x1d   : > { %786 = vrot.lane.b32.xlu0 %v2460_v0, %s2360_s4  ;;  %762 = vrot.lane.b32.xlu1 %v2463_v1, %s2360_s4  ;;  %v2473_v3 = vld [vmem:[%s2457_s30 + $0x4] sm:$0xf]  ;;  %s2367_s11 = smov 96   ;;  %v2536_v4 = vld [vmem:[%s2457_s30 + $0x38] sm:$0xf]  ;;  %s2369_s26 = smov 12  }
  0x1e   : > { %v2539_v5 = vld [vmem:[%s2457_s30 + $0x3c] sm:$0xf]  ;;  %v2546_v6 = vld [vmem:[%s2457_s30 + $0x8] sm:$0xf]  ;;  %v2549_v7 = vld [vmem:[%s2457_s30 + $0xc] sm:$0xf] }
  0x1f   : > { %v2624_v14 = vld [vmem:[%s2457_s30 + $0x10] sm:$0xf]  ;;  %v2627_v15 = vld [vmem:[%s2457_s30 + $0x14] sm:$0xf]  ;;  %v2694_v32 = vld [vmem:[%s2457_s30 + $0x18] sm:$0xf] }
  0x20   : > { %3623 = vst [vmem:[#allocation6_spill] sm:$0xff] %v2624_v14  ;;  %3624 = vst [vmem:[#allocation7_spill] sm:$0xff] %v2627_v15  ;;  %v2697_v33 = vld [vmem:[%s2457_s30 + $0x1c] sm:$0xf]  ;;  %v2764_v50 = vld [vmem:[%s2457_s30 + $0x20] sm:$0xf] }
  0x21   : > { %788 = vrot.lane.b32.xlu0 %v2470_v2, %s2360_s4  ;;  %764 = vrot.lane.b32.xlu1 %v2473_v3, %s2360_s4  ;;  %3625 = vst [vmem:[#allocation8_spill] sm:$0xff] %v2694_v32  ;;  %3626 = vst [vmem:[#allocation9_spill] sm:$0xff] %v2697_v33  ;;  %v2767_v51 = vld [vmem:[%s2457_s30 + $0x24] sm:$0xf]  ;;  %s2370_s27 = smov 36   ;;  %s2373_s18 = smov 40  }
  0x22   : > { %3627 = vst [vmem:[#allocation10_spill] sm:$0xff] %v2764_v50  ;;  %3628 = vst [vmem:[#allocation11_spill] sm:$0xff] %v2767_v51  ;;  %s2374_s19 = smov 48  }
  0x25   : > { %932 = vrot.lane.b32.xlu0 %v2460_v0, %s2361_s5  ;;  %934 = vrot.lane.b32.xlu1 %v2470_v2, %s2361_s5 }
  0x29   : > { %375 = vrot.lane.b32.xlu0 %v2460_v0, %s2362_s6  ;;  %377 = vrot.lane.b32.xlu1 %v2470_v2, %s2362_s6 }
  0x2d   : > { %908 = vrot.lane.b32.xlu0 %v2463_v1, %s2361_s5  ;;  %910 = vrot.lane.b32.xlu1 %v2473_v3, %s2361_s5 }
  0x31   : > { %1069 = vrot.lane.b32.xlu0 %v2460_v0, %s2363_s7  ;;  %1071 = vrot.lane.b32.xlu1 %v2470_v2, %s2363_s7 }
  0x35   : > { %351 = vrot.lane.b32.xlu0 %v2463_v1, %s2362_s6  ;;  %353 = vrot.lane.b32.xlu1 %v2473_v3, %s2362_s6 }
  0x39   : > { %512 = vrot.lane.b32.xlu0 %v2460_v0, %s2364_s8  ;;  %514 = vrot.lane.b32.xlu1 %v2470_v2, %s2364_s8 }
  0x3d   : > { %1045 = vrot.lane.b32.xlu0 %v2463_v1, %s2363_s7  ;;  %1047 = vrot.lane.b32.xlu1 %v2473_v3, %s2363_s7 }
  0x41   : > { %1206 = vrot.lane.b32.xlu0 %v2460_v0, %s2365_s9  ;;  %1208 = vrot.lane.b32.xlu1 %v2470_v2, %s2365_s9 }
  0x45   : > { %488 = vrot.lane.b32.xlu0 %v2463_v1, %s2364_s8  ;;  %490 = vrot.lane.b32.xlu1 %v2473_v3, %s2364_s8 }
  0x49   : > { %649 = vrot.lane.b32.xlu0 %v2460_v0, %s2366_s10  ;;  %651 = vrot.lane.b32.xlu1 %v2470_v2, %s2366_s10 }
  0x4d   : > { %1182 = vrot.lane.b32.xlu0 %v2463_v1, %s2365_s9  ;;  %1184 = vrot.lane.b32.xlu1 %v2473_v3, %s2365_s9 }
  0x51   : > { %1343 = vrot.lane.b32.xlu0 %v2460_v0, %s2367_s11  ;;  %1345 = vrot.lane.b32.xlu1 %v2470_v2, %s2367_s11 }
  0x55   : > { %625 = vrot.lane.b32.xlu0 %v2463_v1, %s2366_s10  ;;  %627 = vrot.lane.b32.xlu1 %v2473_v3, %s2366_s10 }
  0x59   : > { %1319 = vrot.lane.b32.xlu0 %v2463_v1, %s2367_s11  ;;  %1321 = vrot.lane.b32.xlu1 %v2473_v3, %s2367_s11 }
  0x5d   : > { %790 = vrot.lane.b32.xlu0 %v2536_v4, %s2360_s4  ;;  %792 = vrot.lane.b32.xlu1 %v2539_v5, %s2360_s4 }
  0x61   : > { %766 = vrot.lane.b32.xlu0 %v2546_v6, %s2360_s4  ;;  %768 = vrot.lane.b32.xlu1 %v2549_v7, %s2360_s4 }
  0x65   : > { %936 = vrot.lane.b32.xlu0 %v2536_v4, %s2361_s5  ;;  %938 = vrot.lane.b32.xlu1 %v2539_v5, %s2361_s5 }
  0x69   : > { %379 = vrot.lane.b32.xlu0 %v2536_v4, %s2362_s6  ;;  %381 = vrot.lane.b32.xlu1 %v2539_v5, %s2362_s6 }
  0x6d   : > { %912 = vrot.lane.b32.xlu0 %v2546_v6, %s2361_s5  ;;  %914 = vrot.lane.b32.xlu1 %v2549_v7, %s2361_s5 }
  0x71   : > { %1073 = vrot.lane.b32.xlu0 %v2536_v4, %s2363_s7  ;;  %1075 = vrot.lane.b32.xlu1 %v2539_v5, %s2363_s7 }
  0x75   : > { %355 = vrot.lane.b32.xlu0 %v2546_v6, %s2362_s6  ;;  %357 = vrot.lane.b32.xlu1 %v2549_v7, %s2362_s6 }
  0x79   : > { %516 = vrot.lane.b32.xlu0 %v2536_v4, %s2364_s8  ;;  %518 = vrot.lane.b32.xlu1 %v2539_v5, %s2364_s8 }
  0x7d   : > { %1049 = vrot.lane.b32.xlu0 %v2546_v6, %s2363_s7  ;;  %1051 = vrot.lane.b32.xlu1 %v2549_v7, %s2363_s7 }
  0x81   : > { %1210 = vrot.lane.b32.xlu0 %v2536_v4, %s2365_s9  ;;  %1212 = vrot.lane.b32.xlu1 %v2539_v5, %s2365_s9 }
  0x85   : > { %492 = vrot.lane.b32.xlu0 %v2546_v6, %s2364_s8  ;;  %494 = vrot.lane.b32.xlu1 %v2549_v7, %s2364_s8 }
  0x89   : > { %653 = vrot.lane.b32.xlu0 %v2536_v4, %s2366_s10  ;;  %655 = vrot.lane.b32.xlu1 %v2539_v5, %s2366_s10 }
  0x8d   : > { %1186 = vrot.lane.b32.xlu0 %v2546_v6, %s2365_s9  ;;  %1188 = vrot.lane.b32.xlu1 %v2549_v7, %s2365_s9 }
  0x8f   : > { %v2599_v8 = vpop.permute.xlu0 %786  ;;  %v2601_v9 = vpop.permute.xlu1 %762 }
  0x91   : > { %1347 = vrot.lane.b32.xlu0 %v2536_v4, %s2367_s11  ;;  %1349 = vrot.lane.b32.xlu1 %v2539_v5, %s2367_s11 }
  0x93   : > { %v2607_v10 = vpop.permute.xlu0 %788  ;;  %v2609_v11 = vpop.permute.xlu1 %764 }
  0x95   : > { %629 = vrot.lane.b32.xlu0 %v2546_v6, %s2366_s10  ;;  %631 = vrot.lane.b32.xlu1 %v2549_v7, %s2366_s10 }
  0x97   : > { %v2615_v12 = vpop.permute.xlu0 %932  ;;  %v2617_v13 = vpop.permute.xlu1 %934 }
  0x99   : > { %1323 = vrot.lane.b32.xlu0 %v2546_v6, %s2367_s11  ;;  %1325 = vrot.lane.b32.xlu1 %v2549_v7, %s2367_s11 }
  0x9b   : > { %v2629_v16 = vpop.permute.xlu0 %375  ;;  %v2631_v17 = vpop.permute.xlu1 %377 }
  0x9d   : > { %770 = vrot.lane.b32.xlu0 %v2624_v14, %s2360_s4  ;;  %772 = vrot.lane.b32.xlu1 %v2627_v15, %s2360_s4 }
  0x9f   : > { %v2637_v18 = vpop.permute.xlu0 %908  ;;  %v2639_v19 = vpop.permute.xlu1 %910 }
  0xa1   : > { %916 = vrot.lane.b32.xlu0 %v2624_v14, %s2361_s5  ;;  %918 = vrot.lane.b32.xlu1 %v2627_v15, %s2361_s5 }
  0xa3   : > { %v2645_v20 = vpop.permute.xlu0 %1069  ;;  %v2647_v21 = vpop.permute.xlu1 %1071 }
  0xa5   : > { %359 = vrot.lane.b32.xlu0 %v2624_v14, %s2362_s6  ;;  %361 = vrot.lane.b32.xlu1 %v2627_v15, %s2362_s6 }
  0xa7   : > { %v2653_v22 = vpop.permute.xlu0 %351  ;;  %v2655_v23 = vpop.permute.xlu1 %353 }
  0xa9   : > { %1053 = vrot.lane.b32.xlu0 %v2624_v14, %s2363_s7  ;;  %1055 = vrot.lane.b32.xlu1 %v2627_v15, %s2363_s7 }
  0xab   : > { %v2661_v24 = vpop.permute.xlu0 %512  ;;  %v2663_v25 = vpop.permute.xlu1 %514 }
  0xad   : > { %496 = vrot.lane.b32.xlu0 %v2624_v14, %s2364_s8  ;;  %498 = vrot.lane.b32.xlu1 %v2627_v15, %s2364_s8 }
  0xaf   : > { %v2669_v26 = vpop.permute.xlu0 %1045  ;;  %v2671_v27 = vpop.permute.xlu1 %1047 }
  0xb1   : > { %1190 = vrot.lane.b32.xlu0 %v2624_v14, %s2365_s9  ;;  %1192 = vrot.lane.b32.xlu1 %v2627_v15, %s2365_s9 }
  0xb3   : > { %v2677_v28 = vpop.permute.xlu0 %1206  ;;  %v2679_v29 = vpop.permute.xlu1 %1208 }
  0xb5   : > { %633 = vrot.lane.b32.xlu0 %v2624_v14, %s2366_s10  ;;  %635 = vrot.lane.b32.xlu1 %v2627_v15, %s2366_s10 }
  0xb7   : > { %v2685_v30 = vpop.permute.xlu0 %488  ;;  %v2687_v31 = vpop.permute.xlu1 %490 }
  0xb9   : > { %1327 = vrot.lane.b32.xlu0 %v2624_v14, %s2367_s11  ;;  %1329 = vrot.lane.b32.xlu1 %v2627_v15, %s2367_s11 }
  0xbb   : > { %v2699_v34 = vpop.permute.xlu0 %649  ;;  %v2701_v35 = vpop.permute.xlu1 %651 }
  0xbd   : > { %774 = vrot.lane.b32.xlu0 %v2694_v32, %s2360_s4  ;;  %776 = vrot.lane.b32.xlu1 %v2697_v33, %s2360_s4 }
  0xbf   : > { %v2707_v36 = vpop.permute.xlu0 %1182  ;;  %v2709_v37 = vpop.permute.xlu1 %1184 }
  0xc1   : > { %920 = vrot.lane.b32.xlu0 %v2694_v32, %s2361_s5  ;;  %922 = vrot.lane.b32.xlu1 %v2697_v33, %s2361_s5 }
  0xc3   : > { %v2715_v38 = vpop.permute.xlu0 %1343  ;;  %v2717_v39 = vpop.permute.xlu1 %1345 }
  0xc5   : > { %363 = vrot.lane.b32.xlu0 %v2694_v32, %s2362_s6  ;;  %365 = vrot.lane.b32.xlu1 %v2697_v33, %s2362_s6 }
  0xc7   : > { %v2723_v40 = vpop.permute.xlu0 %625  ;;  %v2725_v41 = vpop.permute.xlu1 %627 }
  0xc9   : > { %1057 = vrot.lane.b32.xlu0 %v2694_v32, %s2363_s7  ;;  %1059 = vrot.lane.b32.xlu1 %v2697_v33, %s2363_s7 }
  0xcb   : > { %v2731_v42 = vpop.permute.xlu0 %1319  ;;  %v2733_v43 = vpop.permute.xlu1 %1321 }
  0xcd   : > { %500 = vrot.lane.b32.xlu0 %v2694_v32, %s2364_s8  ;;  %502 = vrot.lane.b32.xlu1 %v2697_v33, %s2364_s8 }
  0xcf   : > { %v2739_v44 = vpop.permute.xlu0 %790  ;;  %v2741_v45 = vpop.permute.xlu1 %792 }
  0xd1   : > { %1194 = vrot.lane.b32.xlu0 %v2694_v32, %s2365_s9  ;;  %1196 = vrot.lane.b32.xlu1 %v2697_v33, %s2365_s9 }
  0xd3   : > { %v2747_v46 = vpop.permute.xlu0 %766  ;;  %v2749_v47 = vpop.permute.xlu1 %768 }
  0xd5   : > { %637 = vrot.lane.b32.xlu0 %v2694_v32, %s2366_s10  ;;  %639 = vrot.lane.b32.xlu1 %v2697_v33, %s2366_s10 }
  0xd7   : > { %v2755_v48 = vpop.permute.xlu0 %936  ;;  %v2757_v49 = vpop.permute.xlu1 %938 }
  0xd9   : > { %1331 = vrot.lane.b32.xlu0 %v2694_v32, %s2367_s11  ;;  %1333 = vrot.lane.b32.xlu1 %v2697_v33, %s2367_s11 }
  0xdb   : > { %v2769_v52 = vpop.permute.xlu0 %379  ;;  %v2771_v53 = vpop.permute.xlu1 %381 }
  0xdd   : > { %778 = vrot.lane.b32.xlu0 %v2764_v50, %s2360_s4  ;;  %780 = vrot.lane.b32.xlu1 %v2767_v51, %s2360_s4 }
  0xdf   : > { %v2777_v54 = vpop.permute.xlu0 %912  ;;  %v2779_v55 = vpop.permute.xlu1 %914 }
  0xe1   : > { %924 = vrot.lane.b32.xlu0 %v2764_v50, %s2361_s5  ;;  %926 = vrot.lane.b32.xlu1 %v2767_v51, %s2361_s5 }
  0xe3   : > { %v2785_v56 = vpop.permute.xlu0 %1073  ;;  %v2787_v57 = vpop.permute.xlu1 %1075 }
  0xe4   : > { %3629 = vst [vmem:[#allocation12_spill] sm:$0xff] %v2785_v56  ;;  %3630 = vst [vmem:[#allocation13_spill] sm:$0xff] %v2787_v57  ;;  %v411_v57 = vmul.bf16 %v2629_v16, %v2460_v0  ;;  %v957_v16 = vmul.bf16 %v2639_v19, %v2473_v3 }
  0xe5   : > { %367 = vrot.lane.b32.xlu0 %v2764_v50, %s2362_s6  ;;  %369 = vrot.lane.b32.xlu1 %v2767_v51, %s2362_s6 }
  0xe7   : > { %v2793_v58 = vpop.permute.xlu0 %355  ;;  %v2795_v59 = vpop.permute.xlu1 %357 }
  0xe8   : > { %3631 = vst [vmem:[#allocation14_spill] sm:$0xff] %v2793_v58  ;;  %3632 = vst [vmem:[#allocation15_spill] sm:$0xff] %v2795_v59  ;;  %v3658_v59 = vmov 0  }
  0xe9   : > { %1061 = vrot.lane.b32.xlu0 %v2764_v50, %s2363_s7  ;;  %1063 = vrot.lane.b32.xlu1 %v2767_v51, %s2363_s7 }
  0xeb   : > { %v2801_v60 = vpop.permute.xlu0 %516  ;;  %v2803_v61 = vpop.permute.xlu1 %518 }
  0xec   : > { %3633 = vst [vmem:[#allocation16_spill] sm:$0xff] %v2801_v60  ;;  %3634 = vst [vmem:[#allocation17_spill] sm:$0xff] %v2803_v61  ;;  %v2253_v61 = vld [vmem:[%s3603_s2 + $0x20] sm:$0xff]   ;;  %v2254_v60 = vld [vmem:[%s3603_s2 + $0x28] sm:$0xff]  }
  0xed   : > { %504 = vrot.lane.b32.xlu0 %v2764_v50, %s2364_s8  ;;  %506 = vrot.lane.b32.xlu1 %v2767_v51, %s2364_s8 }
  0xef   : > { %v2809_v62 = vpop.permute.xlu0 %1049  ;;  %v2811_v63 = vpop.permute.xlu1 %1051 }
  0xf0   : > { %3635 = vst [vmem:[#allocation18_spill] sm:$0xff] %v2809_v62  ;;  %3636 = vst [vmem:[#allocation19_spill] sm:$0xff] %v2811_v63  ;;  %v2834_v63 = vld [vmem:[%s2457_s30 + $0x28] sm:$0xf] }
  0xf1   : > { %1198 = vrot.lane.b32.xlu0 %v2764_v50, %s2365_s9  ;;  %1200 = vrot.lane.b32.xlu1 %v2767_v51, %s2365_s9  ;;  %3641 = vst [vmem:[#allocation24_spill] sm:$0xff] %v2834_v63 }
  0xf3   : > { %v2817_v33 = vpop.permute.xlu0 %1210  ;;  %v2819_v32 = vpop.permute.xlu1 %1212 }
  0xf4   : > { %3637 = vst [vmem:[#allocation20_spill] sm:$0xff] %v2817_v33  ;;  %3638 = vst [vmem:[#allocation21_spill] sm:$0xff] %v2819_v32  ;;  %v2837_v33 = vld [vmem:[%s2457_s30 + $0x2c] sm:$0xf] }
  0xf5   : > { %641 = vrot.lane.b32.xlu0 %v2764_v50, %s2366_s10  ;;  %643 = vrot.lane.b32.xlu1 %v2767_v51, %s2366_s10 }
  0xf7   : > { %v2825_v15 = vpop.permute.xlu0 %492  ;;  %v2827_v14 = vpop.permute.xlu1 %494 }
  0xf8   : > { %3639 = vst [vmem:[#allocation22_spill] sm:$0xff] %v2825_v15  ;;  %3640 = vst [vmem:[#allocation23_spill] sm:$0xff] %v2827_v14 }
  0xf9   : > { %1335 = vrot.lane.b32.xlu0 %v2764_v50, %s2367_s11  ;;  %1337 = vrot.lane.b32.xlu1 %v2767_v51, %s2367_s11  ;;  %v2249_v51 = vld [vmem:[%s3603_s2] sm:$0xff]  }
  0xfb   : > { %v2839_v32 = vpop.permute.xlu0 %653  ;;  %v2841_v62 = vpop.permute.xlu1 %655 }
  0xfc   : > { %3642 = vst [vmem:[#allocation25_spill] sm:$0xff] %v2839_v32  ;;  %3643 = vst [vmem:[#allocation26_spill] sm:$0xff] %v2841_v62  ;;  %v3617_v62 = vmov 0  }
  0xfd   : > { %782 = vrot.lane.b32.xlu0 %v2834_v63, %s2360_s4  ;;  %784 = vrot.lane.b32.xlu1 %v2837_v33, %s2360_s4  ;;  %s2371_s4 = smov 28  }
  0xfe   : > { %2152 = vmatprep.subr.bf16.mxu1 %v3617_v62  ;;  %1593 = vmatprep.subr.bf16.mxu0 %v3617_v62 }
  0xff   : > { %v2847_v14 = vpop.permute.xlu0 %1186  ;;  %v2849_v50 = vpop.permute.xlu1 %1188  ;;  %2164 = vmatpush1.bf16.msra.mxu1 %v2249_v51  ;;  %1594 = vmatpush1.bf16.msra.mxu0 %v2249_v51  ;;  %v2251_v51 = vld [vmem:[%s3603_s2 + $0x10] sm:$0xff]  }
 0x100   : > { %3644 = vst [vmem:[#allocation27_spill] sm:$0xff] %v2847_v14  ;;  %3645 = vst [vmem:[#allocation28_spill] sm:$0xff] %v2849_v50  ;;  %2153 = vmatprep.subr.bf16.mxu1 %v3617_v62  ;;  %v2250_v50 = vld [vmem:[%s3603_s2 + $0x8] sm:$0xff]   ;;  %1595 = vmatprep.subr.bf16.mxu0 %v3617_v62 }
 0x101   : > { %928 = vrot.lane.b32.xlu0 %v2834_v63, %s2361_s5  ;;  %930 = vrot.lane.b32.xlu1 %v2837_v33, %s2361_s5 }
 0x103   : > { %v2860_v32 = vpop.permute.xlu0 %1347  ;;  %v2862_v14 = vpop.permute.xlu1 %1349  ;;  %2165 = vmatpush1.bf16.msra.mxu1 %v2250_v50  ;;  %1596 = vmatpush1.bf16.msra.mxu0 %v2250_v50  ;;  %v2252_v50 = vld [vmem:[%s3603_s2 + $0x18] sm:$0xff]  }
 0x104   : > { %3646 = vst [vmem:[#allocation29_spill] sm:$0xff] %v2860_v32  ;;  %3647 = vst [vmem:[#allocation30_spill] sm:$0xff] %v2862_v14  ;;  %2154 = vmatprep.subr.bf16.mxu1 %v3617_v62  ;;  %1597 = vmatprep.subr.bf16.mxu0 %v3617_v62 }
 0x105   : > { %371 = vrot.lane.b32.xlu0 %v2834_v63, %s2362_s6  ;;  %373 = vrot.lane.b32.xlu1 %v2837_v33, %s2362_s6 }
 0x107   : > { %v2873_v15 = vpop.permute.xlu0 %629  ;;  %v2875_v32 = vpop.permute.xlu1 %631  ;;  %2166 = vmatpush1.bf16.msra.mxu1 %v2251_v51  ;;  %1598 = vmatpush1.bf16.msra.mxu0 %v2251_v51  ;;  %v274_v51 = vmul.bf16 %v2460_v0, %v2460_v0 }
 0x108   : > { %3648 = vst [vmem:[#allocation31_spill] sm:$0xff] %v2873_v15  ;;  %3649 = vst [vmem:[#allocation32_spill] sm:$0xff] %v2875_v32  ;;  %2155 = vmatprep.subr.bf16.mxu1 %v3617_v62  ;;  %1599 = vmatprep.subr.bf16.mxu0 %v3617_v62 }
 0x109   : > { %1065 = vrot.lane.b32.xlu0 %v2834_v63, %s2363_s7  ;;  %1067 = vrot.lane.b32.xlu1 %v2837_v33, %s2363_s7  ;;  %s2372_s7 = smov 68  }
 0x10b   : > { %v2886_v14 = vpop.permute.xlu0 %1323  ;;  %v2888_v15 = vpop.permute.xlu1 %1325  ;;  %2167 = vmatpush1.bf16.msra.mxu1 %v2252_v50  ;;  %1600 = vmatpush1.bf16.msra.mxu0 %v2252_v50 }
 0x10c   : > { %3650 = vst [vmem:[#allocation33_spill] sm:$0xff] %v2886_v14  ;;  %3651 = vst [vmem:[#allocation34_spill] sm:$0xff] %v2888_v15  ;;  %v275_v15 = vmul.bf16 %v2470_v2, %v2470_v2  ;;  %2156 = vmatprep.subr.bf16.mxu1 %v3617_v62  ;;  %1601 = vmatprep.subr.bf16.mxu0 %v3617_v62 }
 0x10d   : > { %508 = vrot.lane.b32.xlu0 %v2834_v63, %s2364_s8  ;;  %510 = vrot.lane.b32.xlu1 %v2837_v33, %s2364_s8 }
 0x10e   : > { %v2008_v50 = vcombine.low %v274_v51, %v275_v15  ;;  %v823_v15 = vmul.bf16 %v2607_v10, %v2470_v2  ;;  %v2255_v10 = vld [vmem:[%s3603_s2 + $0x30] sm:$0xff]  }
 0x10f   : > { %v2899_v32 = vpop.permute.xlu0 %770  ;;  %v2901_v14 = vpop.permute.xlu1 %772  ;;  %2168 = vmatpush1.bf16.msra.mxu1 %v2253_v61  ;;  %1602 = vmatpush1.bf16.msra.mxu0 %v2253_v61  ;;  %v811_v61 = vmul.bf16 %v2609_v11, %v2473_v3  ;;  %v810_v11 = vmul.bf16 %v2601_v9, %v2463_v1  ;;  %v412_v9 = vmul.bf16 %v2631_v17, %v2470_v2 }
 0x110   : > { %3652 = vst [vmem:[#allocation35_spill] sm:$0xff] %v2899_v32  ;;  %3653 = vst [vmem:[#allocation36_spill] sm:$0xff] %v2901_v14  ;;  %2157 = vmatprep.subr.bf16.mxu1 %v3617_v62  ;;  %1603 = vmatprep.subr.bf16.mxu0 %v3617_v62  ;;  %v263_v62 = vmul.bf16 %v2473_v3, %v2473_v3 }
 0x111   : > { %1202 = vrot.lane.b32.xlu0 %v2834_v63, %s2365_s9  ;;  %1204 = vrot.lane.b32.xlu1 %v2837_v33, %s2365_s9  ;;  %333 = vst.msk [vmem:[#allocation2 + $0x60] sm:$0xff] %vm326_vm0, %v2008_v50  ;;  %v2034_v58 = vcombine.low %v810_v11, %v811_v61  ;;  %v2016_v17 = vcombine.low %v411_v57, %v412_v9 }
 0x113   : > { %v2916_v14 = vpop.permute.xlu0 %916  ;;  %v2918_v32 = vpop.permute.xlu1 %918  ;;  %2169 = vmatpush1.bf16.msra.mxu1 %v2254_v60  ;;  %1604 = vmatpush1.bf16.msra.mxu0 %v2254_v60 }
 0x114   : > { %3654 = vst [vmem:[#allocation37_spill] sm:$0xff] %v2916_v14  ;;  %3655 = vst [vmem:[#allocation38_spill] sm:$0xff] %v2918_v32  ;;  %v262_v32 = vmul.bf16 %v2463_v1, %v2463_v1  ;;  %v822_v14 = vmul.bf16 %v2599_v8, %v2460_v0  ;;  %2158 = vmatprep.subr.bf16.mxu1 %v3658_v59  ;;  %1605 = vmatprep.subr.bf16.mxu0 %v3658_v59 }
 0x115   : > { %645 = vrot.lane.b32.xlu0 %v2834_v63, %s2366_s10  ;;  %647 = vrot.lane.b32.xlu1 %v2837_v33, %s2366_s10  ;;  %v968_v8 = vmul.bf16 %v2615_v12, %v2460_v0  ;;  %v2256_v12 = vld [vmem:[%s3603_s2 + $0x38] sm:$0xff]  }
 0x116   : > { %v2002_v60 = vcombine.low %v262_v32, %v263_v62  ;;  %v1105_v32 = vmul.bf16 %v2645_v20, %v2460_v0  ;;  %v1106_v62 = vmul.bf16 %v2647_v21, %v2470_v2  ;;  %v399_v20 = vmul.bf16 %v2653_v22, %v2463_v1  ;;  %v2258_v22 = vld [vmem:[%s3603_s2 + $0x48] sm:$0xff]  }
 0x117   : > { %v2934_v51 = vpop.permute.xlu0 %359  ;;  %v2936_v50 = vpop.permute.xlu1 %361  ;;  %2170 = vmatpush1.bf16.msra.mxu1 %v2255_v10  ;;  %1606 = vmatpush1.bf16.msra.mxu0 %v2255_v10  ;;  %v400_v21 = vmul.bf16 %v2655_v23, %v2473_v3 }
 0x118   : > { %3656 = vst [vmem:[#allocation39_spill] sm:$0xff] %v2934_v51  ;;  %3657 = vst [vmem:[#allocation40_spill] sm:$0xff] %v2936_v50  ;;  %v2040_v50 = vcombine.low %v822_v14, %v823_v15  ;;  %v969_v51 = vmul.bf16 %v2617_v13, %v2470_v2  ;;  %2159 = vmatprep.subr.bf16.mxu1 %v3658_v59  ;;  %1607 = vmatprep.subr.bf16.mxu0 %v3658_v59 }
 0x119   : > { %1339 = vrot.lane.b32.xlu0 %v2834_v63, %s2367_s11  ;;  %1341 = vrot.lane.b32.xlu1 %v2837_v33, %s2367_s11  ;;  %327 = vst.msk [vmem:[#allocation2] sm:$0xff] %vm326_vm0, %v2002_v60  ;;  %v956_v14 = vmul.bf16 %v2637_v18, %v2463_v1  ;;  %v2257_v18 = vld [vmem:[%s3603_s2 + $0x40] sm:$0xff]   ;;  %v2056_v57 = vcombine.low %v1105_v32, %v1106_v62 }
 0x11a   : > { %v2048_v13 = vcombine.low %v968_v8, %v969_v51  ;;  %v549_v51 = vmul.bf16 %v2663_v25, %v2470_v2  ;;  %v2010_v23 = vcombine.low %v399_v20, %v400_v21  ;;  %v1094_v25 = vmul.bf16 %v2671_v27, %v2473_v3 }
 0x11b   : > { %v2963_v56 = vpop.permute.xlu0 %1053  ;;  %v2965_v63 = vpop.permute.xlu1 %1055  ;;  %2171 = vmatpush1.bf16.msra.mxu1 %v2256_v12  ;;  %1608 = vmatpush1.bf16.msra.mxu0 %v2256_v12  ;;  %v2042_v19 = vcombine.low %v956_v14, %v957_v16  ;;  %v1242_v60 = vmul.bf16 %v2677_v28, %v2460_v0  ;;  %v1243_v8 = vmul.bf16 %v2679_v29, %v2470_v2 }
 0x11c   : > { %2160 = vmatprep.subr.bf16.mxu1 %v3658_v59  ;;  %1609 = vmatprep.subr.bf16.mxu0 %v3658_v59  ;;  %v536_v27 = vmul.bf16 %v2685_v30, %v2463_v1  ;;  %v537_v28 = vmul.bf16 %v2687_v31, %v2473_v3  ;;  %v685_v14 = vmul.bf16 %v2699_v34, %v2460_v0  ;;  %v2260_v30 = vld [vmem:[%s3603_s2 + $0x58] ss:$0 sps:$4 sm:$0x33]  }
 0x11d   : > { %878 = vrot.lane.b32.xlu0 %v2040_v50, %s2364_s8  ;;  %866 = vrot.lane.b32.xlu1 %v2034_v58, %s2364_s8  ;;  %v548_v58 = vmul.bf16 %v2661_v24, %v2460_v0  ;;  %v1093_v24 = vmul.bf16 %v2669_v26, %v2463_v1  ;;  %v2259_v26 = vld [vmem:[%s3603_s2 + $0x50] sm:$0xff]   ;;  %v686_v16 = vmul.bf16 %v2701_v35, %v2470_v2  ;;  %v1591_v34 = vsel %vm1589_vm1, %v2260_v30, 0 }
 0x11e   : > { %v2018_v31 = vcombine.low %v536_v27, %v537_v28  ;;  %v1230_v35 = vmul.bf16 %v2707_v36, %v2463_v1  ;;  %v1231_v62 = vmul.bf16 %v2709_v37, %v2473_v3  ;;  %v277_v36 = vmul.bf16 %v2539_v5, %v2539_v5 }
 0x11f   : > { %v2983_v15 = vpop.permute.xlu0 %496  ;;  %v2985_v61 = vpop.permute.xlu1 %498  ;;  %2172 = vmatpush1.bf16.msra.mxu1 %v2257_v18  ;;  %1610 = vmatpush1.bf16.msra.mxu0 %v2257_v18  ;;  %v2024_v11 = vcombine.low %v548_v58, %v549_v51  ;;  %v2050_v29 = vcombine.low %v1093_v24, %v1094_v25  ;;  %v1379_v18 = vmul.bf16 %v2715_v38, %v2460_v0 }
 0x120   : > { %2161 = vmatprep.subr.bf16.mxu1 %v3658_v59  ;;  %1611 = vmatprep.subr.bf16.mxu0 %v3658_v59  ;;  %v2058_v37 = vcombine.low %v1230_v35, %v1231_v62  ;;  %v673_v38 = vmul.bf16 %v2723_v40, %v2463_v1  ;;  %v1367_v58 = vmul.bf16 %v2731_v42, %v2463_v1 }
 0x121   : > { %1024 = vrot.lane.b32.xlu0 %v2048_v13, %s2369_s26  ;;  %467 = vrot.lane.b32.xlu1 %v2016_v17, %s2370_s27  ;;  %v2064_v13 = vcombine.low %v1242_v60, %v1243_v8  ;;  %v1368_v51 = vmul.bf16 %v2733_v43, %v2473_v3  ;;  %v824_v40 = vmul.bf16 %v2739_v44, %v2536_v4 }
 0x122   : > { %v825_v1 = vmul.bf16 %v2741_v45, %v2539_v5  ;;  %v265_v44 = vmul.bf16 %v2549_v7, %v2549_v7  ;;  %v971_v8 = vmul.bf16 %v2757_v49, %v2539_v5  ;;  %v414_v27 = vmul.bf16 %v2771_v53, %v2539_v5  ;;  %v3660_v53 = vld [vmem:[#allocation13_spill] sm:$0xff] }
 0x123   : > { %v3002_v50 = vpop.permute.xlu0 %1190  ;;  %v3004_v10 = vpop.permute.xlu1 %1192  ;;  %2173 = vmatpush1.bf16.msra.mxu1 %v2258_v22  ;;  %1612 = vmatpush1.bf16.msra.mxu0 %v2258_v22  ;;  %v2066_v43 = vcombine.low %v1367_v58, %v1368_v51  ;;  %v959_v49 = vmul.bf16 %v2779_v55, %v2549_v7  ;;  %v3661_v55 = vld [vmem:[#allocation14_spill] sm:$0xff]  ;;  %v3666_v58 = vld [vmem:[#allocation19_spill] sm:$0xff] }
 0x124   : > { %2162 = vmatprep.subr.bf16.mxu1 %v3658_v59  ;;  %1613 = vmatprep.subr.bf16.mxu0 %v3658_v59  ;;  %v401_v62 = vmul.bf16 %v3661_v55, %v2546_v6  ;;  %v1096_v51 = vmul.bf16 %v3666_v58, %v2549_v7  ;;  %v3675_v55 = vld [vmem:[#allocation29_spill] sm:$0xff]  ;;  %v3678_v58 = vld [vmem:[#allocation7_spill] sm:$0xff] }
 0x125   : > { %1012 = vrot.lane.b32.xlu0 %v2042_v19, %s2369_s26  ;;  %1161 = vrot.lane.b32.xlu1 %v2056_v57, %s2371_s4  ;;  %v2032_v19 = vcombine.low %v685_v14, %v686_v16  ;;  %v276_v57 = vmul.bf16 %v2536_v4, %v2536_v4  ;;  %v1108_v14 = vmul.bf16 %v3660_v53, %v2539_v5 }
 0x127   : > { %v3021_v9 = vpop.permute.xlu0 %633  ;;  %v3023_v12 = vpop.permute.xlu1 %635  ;;  %2174 = vmatpush1.bf16.msra.mxu1 %v2259_v26  ;;  %1614 = vmatpush1.bf16.msra.mxu0 %v2259_v26  ;;  %v2009_v0 = vcombine.low %v276_v57, %v277_v36  ;;  %v413_v26 = vmul.bf16 %v2769_v52, %v2536_v4  ;;  %v3659_v52 = vld [vmem:[#allocation12_spill] sm:$0xff]  ;;  %v3664_v36 = vld [vmem:[#allocation17_spill] sm:$0xff] }
 0x128   : > { %2163 = vmatprep.subr.bf16.mxu1 %v3658_v59  ;;  %1615 = vmatprep.subr.bf16.mxu0 %v3658_v59  ;;  %v1380_v59 = vmul.bf16 %v2717_v39, %v2470_v2  ;;  %v674_v39 = vmul.bf16 %v2725_v41, %v2473_v3  ;;  %v812_v3 = vmul.bf16 %v2747_v46, %v2546_v6 }
 0x129   : > { %455 = vrot.lane.b32.xlu0 %v2010_v23, %s2370_s27  ;;  %604 = vrot.lane.b32.xlu1 %v2024_v11, %s2372_s7  ;;  %334 = vst.msk [vmem:[#allocation2 + $0x70] sm:$0xff] %vm326_vm0, %v2009_v0  ;;  %v813_v41 = vmul.bf16 %v2749_v47, %v2549_v7  ;;  %v264_v11 = vmul.bf16 %v2546_v6, %v2546_v6 }
 0x12a   : > { %v2072_v2 = vcombine.low %v1379_v18, %v1380_v59  ;;  %v2026_v42 = vcombine.low %v673_v38, %v674_v39  ;;  %v2041_v46 = vcombine.low %v824_v40, %v825_v1  ;;  %v970_v47 = vmul.bf16 %v2755_v48, %v2536_v4  ;;  %v3662_v18 = vld [vmem:[#allocation15_spill] sm:$0xff]  ;;  %v3665_v38 = vld [vmem:[#allocation18_spill] sm:$0xff]  ;;  %v3667_v40 = vld [vmem:[#allocation20_spill] sm:$0xff] }
 0x12b   : > { %v3040_v17 = vpop.permute.xlu0 %1327  ;;  %v3042_v32 = vpop.permute.xlu1 %1329  ;;  %2175 = vmatpush1.bf16.msra.mxu1 %v1591_v34  ;;  %1616 = vmatpush1.bf16.msra.mxu0 %v1591_v34  ;;  %v2003_v45 = vcombine.low %v264_v11, %v265_v44  ;;  %v2035_v60 = vcombine.low %v812_v3, %v813_v41  ;;  %v958_v48 = vmul.bf16 %v2777_v54, %v2546_v6  ;;  %v3668_v3 = vld [vmem:[#allocation21_spill] sm:$0xff] }
 0x12c   : > { %v2049_v16 = vcombine.low %v970_v47, %v971_v8  ;;  %v2017_v30 = vcombine.low %v413_v26, %v414_v27  ;;  %v402_v59 = vmul.bf16 %v3662_v18, %v2549_v7  ;;  %v551_v0 = vmul.bf16 %v3664_v36, %v2539_v5  ;;  %v3670_v8 = vld [vmem:[#allocation23_spill] sm:$0xff]  ;;  %v3671_v27 = vld [vmem:[#allocation25_spill] sm:$0xff]  ;;  %v3676_v18 = vld [vmem:[#allocation30_spill] sm:$0xff] }
 0x12d   : > { %1149 = vrot.lane.b32.xlu0 %v2050_v29, %s2371_s4  ;;  %1298 = vrot.lane.b32.xlu1 %v2064_v13, %s2373_s18  ;;  %328 = vst.msk [vmem:[#allocation2 + $0x10] sm:$0xff] %vm326_vm0, %v2003_v45  ;;  %v1107_v13 = vmul.bf16 %v3659_v52, %v2536_v4  ;;  %v2043_v54 = vcombine.low %v958_v48, %v959_v49  ;;  %v3672_v49 = vld [vmem:[#allocation26_spill] sm:$0xff] }
 0x12e   : > { %v1095_v39 = vmul.bf16 %v3665_v38, %v2546_v6  ;;  %v1244_v1 = vmul.bf16 %v3667_v40, %v2536_v4  ;;  %v1245_v41 = vmul.bf16 %v3668_v3, %v2539_v5  ;;  %v539_v26 = vmul.bf16 %v3670_v8, %v2549_v7  ;;  %v3677_v38 = vld [vmem:[#allocation6_spill] sm:$0xff] }
 0x12f   : > { %v3060_v20 = vpop.permute.xlu0 %774  ;;  %v3062_v21 = vpop.permute.xlu1 %776  ;;  %v2057_v35 = vcombine.low %v1107_v13, %v1108_v14  ;;  %v687_v48 = vmul.bf16 %v3671_v27, %v2536_v4  ;;  %v688_v52 = vmul.bf16 %v3672_v49, %v2539_v5  ;;  %v3175_v14 = vld [vmem:[%s3602_s1] sm:$0xff]  }
 0x130   : > { %v2051_v45 = vcombine.low %v1095_v39, %v1096_v51  ;;  %2130 = vmatprep.subr.bf16.mxu1 %v3175_v14  ;;  %v266_v39 = vmul.bf16 %v3677_v38, %v3677_v38  ;;  %v267_v51 = vmul.bf16 %v3678_v58, %v3678_v58 }
 0x131   : > { %592 = vrot.lane.b32.xlu0 %v2018_v31, %s2372_s7  ;;  %741 = vrot.lane.b32.xlu1 %v2032_v19, %s2367_s11  ;;  %v3663_v19 = vld [vmem:[#allocation16_spill] sm:$0xff] }
 0x132   : > { %v550_v57 = vmul.bf16 %v3663_v19, %v2536_v4 }
 0x133   : > { %v3078_v22 = vpop.permute.xlu0 %920  ;;  %v3080_v23 = vpop.permute.xlu1 %922 }
 0x135   : > { %1286 = vrot.lane.b32.xlu0 %v2058_v37, %s2373_s18  ;;  %1435 = vrot.lane.b32.xlu1 %v2072_v2, %s2374_s19 }
 0x137   : > { %v3093_v24 = vpop.permute.xlu0 %363  ;;  %v3095_v25 = vpop.permute.xlu1 %365 }
 0x139   : > { %729 = vrot.lane.b32.xlu0 %v2026_v42, %s2367_s11  ;;  %1423 = vrot.lane.b32.xlu1 %v2066_v43, %s2374_s19  ;;  %v2011_v42 = vcombine.low %v401_v62, %v402_v59  ;;  %v2025_v43 = vcombine.low %v550_v57, %v551_v0  ;;  %v1381_v62 = vmul.bf16 %v3675_v55, %v2536_v4 }
 0x13a   : > { %v1382_v59 = vmul.bf16 %v3676_v18, %v2539_v5  ;;  %v2033_v57 = vcombine.low %v687_v48, %v688_v52  ;;  %v2004_v4 = vcombine.low %v266_v39, %v267_v51  ;;  %v3684_v48 = vld [vmem:[#allocation36_spill] sm:$0xff]  ;;  %v1097_v51 = vmul.bf16 %v2963_v56, %v3677_v38 }
 0x13b   : > { %v3111_v28 = vpop.permute.xlu0 %1057  ;;  %v3113_v29 = vpop.permute.xlu1 %1059  ;;  %v815_v49 = vmul.bf16 %v3684_v48, %v3678_v58  ;;  %v1234_v56 = vmul.bf16 %v3002_v50, %v3677_v38  ;;  %v678_v48 = vmul.bf16 %v3023_v12, %v3678_v58 }
 0x13c   : > { %v2073_v40 = vcombine.low %v1381_v62, %v1382_v59  ;;  %329 = vst.msk [vmem:[#allocation2 + $0x20] sm:$0xff] %vm326_vm0, %v2004_v4  ;;  %v3687_v59 = vld [vmem:[#allocation39_spill] sm:$0xff]  ;;  %v1098_v4 = vmul.bf16 %v2965_v63, %v3678_v58  ;;  %v1235_v63 = vmul.bf16 %v3004_v10, %v3678_v58  ;;  %v677_v10 = vmul.bf16 %v3021_v9, %v3677_v38 }
 0x13d   : > { %880 = vrot.lane.b32.xlu0 %v2041_v46, %s2364_s8  ;;  %868 = vrot.lane.b32.xlu1 %v2035_v60, %s2364_s8  ;;  %v2065_v46 = vcombine.low %v1244_v1, %v1245_v41  ;;  %v3669_v60 = vld [vmem:[#allocation22_spill] sm:$0xff]  ;;  %v3679_v1 = vld [vmem:[#allocation31_spill] sm:$0xff]  ;;  %v3680_v41 = vld [vmem:[#allocation32_spill] sm:$0xff] }
 0x13e   : > { %v538_v47 = vmul.bf16 %v3669_v60, %v2546_v6  ;;  %v675_v3 = vmul.bf16 %v3679_v1, %v2546_v6  ;;  %v540_v1 = vmul.bf16 %v2983_v15, %v3677_v38 }
 0x13f   : > { %v3126_v31 = vpop.permute.xlu0 %500  ;;  %v3128_v34 = vpop.permute.xlu1 %502 }
 0x140   : > { %v2019_v19 = vcombine.low %v538_v47, %v539_v26  ;;  %v3683_v26 = vld [vmem:[#allocation35_spill] sm:$0xff] }
 0x141   : > { %1026 = vrot.lane.b32.xlu0 %v2049_v16, %s2369_s26  ;;  %469 = vrot.lane.b32.xlu1 %v2017_v30, %s2370_s27  ;;  %v3673_v16 = vld [vmem:[#allocation27_spill] sm:$0xff]  ;;  %v814_v27 = vmul.bf16 %v3683_v26, %v3677_v38  ;;  %v3690_v26 = vld [vmem:[#allocation9_spill] sm:$0xff] }
 0x142   : > { %v1232_v30 = vmul.bf16 %v3673_v16, %v2546_v6  ;;  %v269_v15 = vmul.bf16 %v3690_v26, %v3690_v26  ;;  %v817_v12 = vmul.bf16 %v3062_v21, %v3690_v26 }
 0x143   : > { %v3140_v37 = vpop.permute.xlu0 %1194  ;;  %v3142_v2 = vpop.permute.xlu1 %1196  ;;  %v2036_v62 = vcombine.low %v814_v27, %v815_v49  ;;  %v2060_v27 = vcombine.low %v1234_v56, %v1235_v63  ;;  %v1371_v49 = vmul.bf16 %v3040_v17, %v3677_v38 }
 0x145   : > { %1014 = vrot.lane.b32.xlu0 %v2043_v54, %s2369_s26  ;;  %1163 = vrot.lane.b32.xlu1 %v2057_v35, %s2371_s4  ;;  %v3674_v54 = vld [vmem:[#allocation28_spill] sm:$0xff] }
 0x146   : > { %v1233_v35 = vmul.bf16 %v3674_v54, %v2549_v7 }
 0x147   : > { %v3154_v11 = vpop.permute.xlu0 %637  ;;  %v3156_v44 = vpop.permute.xlu1 %639 }
 0x148   : > { %v2059_v5 = vcombine.low %v1232_v30, %v1233_v35  ;;  %v680_v63 = vmul.bf16 %v3156_v44, %v3690_v26 }
 0x149   : > { %457 = vrot.lane.b32.xlu0 %v2011_v42, %s2370_s27  ;;  %606 = vrot.lane.b32.xlu1 %v2025_v43, %s2372_s7  ;;  %v676_v42 = vmul.bf16 %v3680_v41, %v2549_v7  ;;  %v3681_v43 = vld [vmem:[#allocation33_spill] sm:$0xff] }
 0x14b   : > { %v3168_v13 = vpop.permute.xlu0 %1331  ;;  %v3170_v53 = vpop.permute.xlu1 %1333  ;;  %v2027_v30 = vcombine.low %v675_v3, %v676_v42  ;;  %v541_v3 = vmul.bf16 %v2985_v61, %v3678_v58  ;;  %v2052_v42 = vcombine.low %v1097_v51, %v1098_v4  ;;  %v3691_v4 = vld [vmem:[#allocation10_spill] sm:$0xff] }
 0x14d   : > { %1151 = vrot.lane.b32.xlu0 %v2051_v45, %s2371_s4  ;;  %1300 = vrot.lane.b32.xlu1 %v2065_v46, %s2373_s18  ;;  %v1369_v45 = vmul.bf16 %v3681_v43, %v2546_v6  ;;  %v3682_v46 = vld [vmem:[#allocation34_spill] sm:$0xff]  ;;  %v3685_v6 = vld [vmem:[#allocation37_spill] sm:$0xff]  ;;  %v2020_v50 = vcombine.low %v540_v1, %v541_v3  ;;  %v270_v1 = vmul.bf16 %v3691_v4, %v3691_v4  ;;  %v3692_v3 = vld [vmem:[#allocation11_spill] sm:$0xff] }
 0x14e   : > { %v1370_v60 = vmul.bf16 %v3682_v46, %v2549_v7  ;;  %v960_v52 = vmul.bf16 %v3685_v6, %v3677_v38  ;;  %v3686_v7 = vld [vmem:[#allocation38_spill] sm:$0xff]  ;;  %v3689_v46 = vld [vmem:[#allocation8_spill] sm:$0xff]  ;;  %v1372_v6 = vmul.bf16 %v3042_v32, %v3678_v58  ;;  %v963_v32 = vmul.bf16 %v3080_v23, %v3690_v26 }
 0x14f   : > { %v3188_v36 = vpop.permute.xlu0 %778  ;;  %v3190_v0 = vpop.permute.xlu1 %780  ;;  %v961_v16 = vmul.bf16 %v3686_v7, %v3678_v58  ;;  %v816_v9 = vmul.bf16 %v3060_v20, %v3689_v46  ;;  %v962_v17 = vmul.bf16 %v3078_v22, %v3689_v46  ;;  %v405_v21 = vmul.bf16 %v3093_v24, %v3689_v46 }
 0x150   : > { %v2067_v54 = vcombine.low %v1369_v45, %v1370_v60  ;;  %v268_v60 = vmul.bf16 %v3689_v46, %v3689_v46  ;;  %v406_v22 = vmul.bf16 %v3095_v25, %v3690_v26  ;;  %v1099_v23 = vmul.bf16 %v3111_v28, %v3689_v46 }
 0x151   : > { %594 = vrot.lane.b32.xlu0 %v2019_v19, %s2372_s7  ;;  %743 = vrot.lane.b32.xlu1 %v2033_v57, %s2367_s11  ;;  %v2044_v18 = vcombine.low %v960_v52, %v961_v16  ;;  %v403_v19 = vmul.bf16 %v3687_v59, %v3677_v38  ;;  %v3688_v57 = vld [vmem:[#allocation40_spill] sm:$0xff]  ;;  %v2028_v38 = vcombine.low %v677_v10, %v678_v48 }
 0x152   : > { %v404_v39 = vmul.bf16 %v3688_v57, %v3678_v58  ;;  %v2005_v61 = vcombine.low %v268_v60, %v269_v15  ;;  %v2068_v58 = vcombine.low %v1371_v49, %v1372_v6  ;;  %v2037_v20 = vcombine.low %v816_v9, %v817_v12 }
 0x153   : > { %v3206_v47 = vpop.permute.xlu0 %924  ;;  %v3208_v8 = vpop.permute.xlu1 %926  ;;  %v542_v24 = vmul.bf16 %v3126_v31, %v3689_v46  ;;  %v543_v25 = vmul.bf16 %v3128_v34, %v3690_v26  ;;  %v1236_v28 = vmul.bf16 %v3140_v37, %v3689_v46  ;;  %v271_v31 = vmul.bf16 %v3692_v3, %v3692_v3 }
 0x154   : > { %v2012_v41 = vcombine.low %v403_v19, %v404_v39  ;;  %330 = vst.msk [vmem:[#allocation2 + $0x30] sm:$0xff] %vm326_vm0, %v2005_v61  ;;  %v2013_v19 = vcombine.low %v405_v21, %v406_v22  ;;  %v819_v44 = vmul.bf16 %v3190_v0, %v3692_v3 }
 0x155   : > { %1288 = vrot.lane.b32.xlu0 %v2059_v5, %s2373_s18  ;;  %1437 = vrot.lane.b32.xlu1 %v2073_v40, %s2374_s19  ;;  %v2006_v34 = vcombine.low %v270_v1, %v271_v31  ;;  %v2021_v37 = vcombine.low %v542_v24, %v543_v25 }
 0x157   : > { %v3221_v35 = vpop.permute.xlu0 %367  ;;  %v3223_v55 = vpop.permute.xlu1 %369  ;;  %331 = vst.msk [vmem:[#allocation2 + $0x40] sm:$0xff] %vm326_vm0, %v2006_v34 }
 0x158   : > { %v407_v0 = vmul.bf16 %v3221_v35, %v3691_v4 }
 0x159   : > { %731 = vrot.lane.b32.xlu0 %v2027_v30, %s2367_s11  ;;  %1425 = vrot.lane.b32.xlu1 %v2067_v54, %s2374_s19  ;;  %v2045_v54 = vcombine.low %v962_v17, %v963_v32  ;;  %v3693_v32 = vld [vmem:[#allocation24_spill] sm:$0xff] }
 0x15b   : > { %v3235_v5 = vpop.permute.xlu0 %1061  ;;  %v3237_v40 = vpop.permute.xlu1 %1063 }
 0x15c   : > { %v1102_v10 = vmul.bf16 %v3237_v40, %v3692_v3 }
 0x15d   : > { %870 = vrot.lane.b32.xlu0 %v2036_v62, %s2364_s8  ;;  %1016 = vrot.lane.b32.xlu1 %v2044_v18, %s2369_s26  ;;  %v1100_v62 = vmul.bf16 %v3113_v29, %v3690_v26  ;;  %v1237_v29 = vmul.bf16 %v3142_v2, %v3690_v26  ;;  %v679_v2 = vmul.bf16 %v3154_v11, %v3689_v46 }
 0x15e   : > { %v818_v11 = vmul.bf16 %v3188_v36, %v3691_v4 }
 0x15f   : > { %v3249_v43 = vpop.permute.xlu0 %504  ;;  %v3251_v45 = vpop.permute.xlu1 %506  ;;  %v2053_v57 = vcombine.low %v1099_v23, %v1100_v62  ;;  %v2061_v56 = vcombine.low %v1236_v28, %v1237_v29 }
 0x160   : > { %v2038_v36 = vcombine.low %v818_v11, %v819_v44  ;;  %v544_v6 = vmul.bf16 %v3249_v43, %v3691_v4  ;;  %v545_v35 = vmul.bf16 %v3251_v45, %v3692_v3 }
 0x161   : > { %459 = vrot.lane.b32.xlu0 %v2012_v41, %s2370_s27  ;;  %1153 = vrot.lane.b32.xlu1 %v2052_v42, %s2371_s4  ;;  %v1373_v41 = vmul.bf16 %v3168_v13, %v3689_v46  ;;  %v1374_v42 = vmul.bf16 %v3170_v53, %v3690_v26  ;;  %v964_v13 = vmul.bf16 %v3206_v47, %v3691_v4 }
 0x162   : > { %v965_v53 = vmul.bf16 %v3208_v8, %v3692_v3  ;;  %v2029_v46 = vcombine.low %v679_v2, %v680_v63  ;;  %v408_v47 = vmul.bf16 %v3223_v55, %v3692_v3  ;;  %v1101_v8 = vmul.bf16 %v3235_v5, %v3691_v4 }
 0x163   : > { %v3267_v52 = vpop.permute.xlu0 %1198  ;;  %v3269_v7 = vpop.permute.xlu1 %1200  ;;  %v2069_v26 = vcombine.low %v1373_v41, %v1374_v42  ;;  %v2022_v45 = vcombine.low %v544_v6, %v545_v35 }
 0x164   : > { %v1238_v55 = vmul.bf16 %v3267_v52, %v3691_v4  ;;  %v1239_v5 = vmul.bf16 %v3269_v7, %v3692_v3  ;;  %v2014_v9 = vcombine.low %v407_v0, %v408_v47  ;;  %v2054_v40 = vcombine.low %v1101_v8, %v1102_v10 }
 0x165   : > { %596 = vrot.lane.b32.xlu0 %v2020_v50, %s2372_s7  ;;  %1290 = vrot.lane.b32.xlu1 %v2060_v27, %s2373_s18  ;;  %v2046_v27 = vcombine.low %v964_v13, %v965_v53 }
 0x166   : > { %v2062_v52 = vcombine.low %v1238_v55, %v1239_v5 }
 0x167   : > { %v3282_v16 = vpop.permute.xlu0 %641  ;;  %v3284_v30 = vpop.permute.xlu1 %643 }
 0x168   : > { %v681_v7 = vmul.bf16 %v3282_v16, %v3691_v4 }
 0x169   : > { %733 = vrot.lane.b32.xlu0 %v2028_v38, %s2367_s11  ;;  %1427 = vrot.lane.b32.xlu1 %v2068_v58, %s2374_s19  ;;  %v272_v38 = vmul.bf16 %v3693_v32, %v3693_v32  ;;  %v273_v58 = vmul.bf16 %v2837_v33, %v2837_v33 }
 0x16b   : > { %v3296_v18 = vpop.permute.xlu0 %1335  ;;  %v3298_v59 = vpop.permute.xlu1 %1337  ;;  %v2007_v43 = vcombine.low %v272_v38, %v273_v58 }
 0x16c   : > { %v1376_v21 = vmul.bf16 %v3298_v59, %v3692_v3 }
 0x16d   : > { %872 = vrot.lane.b32.xlu0 %v2037_v20, %s2364_s8  ;;  %1018 = vrot.lane.b32.xlu1 %v2045_v54, %s2369_s26  ;;  %v682_v20 = vmul.bf16 %v3284_v30, %v3692_v3  ;;  %v1375_v54 = vmul.bf16 %v3296_v18, %v3691_v4  ;;  %332 = vst.msk [vmem:[#allocation2 + $0x50] sm:$0xff] %vm326_vm0, %v2007_v43  ;;  %v2263_v43 = vld [vmem:[%s3602_s1 + $0x10] ss:$0 sps:$4 sm:$0x33]  }
 0x16f   : > { %v3310_v39 = vpop.permute.xlu0 %782  ;;  %v3312_v51 = vpop.permute.xlu1 %784  ;;  %v2030_v24 = vcombine.low %v681_v7, %v682_v20  ;;  %v2070_v59 = vcombine.low %v1375_v54, %v1376_v21 }
 0x170   : > { %v820_v16 = vmul.bf16 %v3310_v39, %v3693_v32  ;;  %v821_v30 = vmul.bf16 %v3312_v51, %v2837_v33 }
 0x171   : > { %461 = vrot.lane.b32.xlu0 %v2013_v19, %s2370_s27  ;;  %1155 = vrot.lane.b32.xlu1 %v2053_v57, %s2371_s4 }
 0x172   : > { %v2039_v29 = vcombine.low %v820_v16, %v821_v30 }
 0x173   : > { %v929_v60 = vpop.permute.xlu0 %928  ;;  %v931_v15 = vpop.permute.xlu1 %930 }
 0x174   : > { %v966_v62 = vmul.bf16 %v929_v60, %v3693_v32  ;;  %v967_v18 = vmul.bf16 %v931_v15, %v2837_v33 }
 0x175   : > { %598 = vrot.lane.b32.xlu0 %v2021_v37, %s2372_s7  ;;  %1292 = vrot.lane.b32.xlu1 %v2061_v56, %s2373_s18 }
 0x176   : > { %v2047_v19 = vcombine.low %v966_v62, %v967_v18 }
 0x177   : > { %v3339_v61 = vpop.permute.xlu0 %371  ;;  %v3341_v50 = vpop.permute.xlu1 %373 }
 0x178   : > { %v409_v57 = vmul.bf16 %v3339_v61, %v3693_v32  ;;  %v410_v39 = vmul.bf16 %v3341_v50, %v2837_v33 }
 0x179   : > { %735 = vrot.lane.b32.xlu0 %v2029_v46, %s2367_s11  ;;  %1429 = vrot.lane.b32.xlu1 %v2069_v26, %s2374_s19 }
 0x17a   : > { %v2015_v2 = vcombine.low %v409_v57, %v410_v39 }
 0x17b   : > { %v1066_v48 = vpop.permute.xlu0 %1065  ;;  %v1068_v49 = vpop.permute.xlu1 %1067 }
 0x17c   : > { %v1103_v51 = vmul.bf16 %v1066_v48, %v3693_v32  ;;  %v1104_v4 = vmul.bf16 %v1068_v49, %v2837_v33 }
 0x17d   : > { %874 = vrot.lane.b32.xlu0 %v2038_v36, %s2364_s8  ;;  %1020 = vrot.lane.b32.xlu1 %v2046_v27, %s2369_s26 }
 0x17e   : > { %v2055_v63 = vcombine.low %v1103_v51, %v1104_v4 }
 0x17f   : > { %v509_v12 = vpop.permute.xlu0 %508  ;;  %v511_v17 = vpop.permute.xlu1 %510 }
 0x180   : > { %v546_v31 = vmul.bf16 %v509_v12, %v3693_v32  ;;  %v547_v34 = vmul.bf16 %v511_v17, %v2837_v33  ;;  %v2262_v12 = vld [vmem:[%s3602_s1 + $0x8] sm:$0xff]  }
 0x181   : > { %463 = vrot.lane.b32.xlu0 %v2014_v9, %s2370_s27  ;;  %1157 = vrot.lane.b32.xlu1 %v2054_v40, %s2371_s4 }
 0x182   : > { %v2023_v60 = vcombine.low %v546_v31, %v547_v34  ;;  %v2266_v31 = vld [vmem:[%s2457_s30 + $0x8] sm:$0xf]  ;;  %v2267_v34 = vld [vmem:[%s2457_s30 + $0xc] sm:$0xf] }
 0x183   : > { %v1203_v22 = vpop.permute.xlu0 %1202  ;;  %v1205_v23 = vpop.permute.xlu1 %1204 }
 0x184   : > { %v1240_v37 = vmul.bf16 %v1203_v22, %v3693_v32  ;;  %v1241_v56 = vmul.bf16 %v1205_v23, %v2837_v33 }
 0x185   : > { %600 = vrot.lane.b32.xlu0 %v2022_v45, %s2372_s7  ;;  %1294 = vrot.lane.b32.xlu1 %v2062_v52, %s2373_s18 }
 0x186   : > { %v2063_v15 = vcombine.low %v1240_v37, %v1241_v56  ;;  %v2095_v37 = vcombine.low %v2266_v31, %v2267_v34  ;;  %v2268_v56 = vld [vmem:[%s2457_s30 + $0x10] sm:$0xf] }
 0x187   : > { %v646_v25 = vpop.permute.xlu0 %645  ;;  %v648_v28 = vpop.permute.xlu1 %647 }
 0x188   : > { %v683_v11 = vmul.bf16 %v646_v25, %v3693_v32  ;;  %v684_v44 = vmul.bf16 %v648_v28, %v2837_v33  ;;  %v2265_v25 = vld [vmem:[%s2457_s30 + $0x4] sm:$0xf] }
 0x189   : > { %737 = vrot.lane.b32.xlu0 %v2030_v24, %s2367_s11  ;;  %1431 = vrot.lane.b32.xlu1 %v2070_v59, %s2374_s19  ;;  %v2264_v59 = vld [vmem:[%s2457_s30] sm:$0xf] }
 0x18a   : > { %v2031_v61 = vcombine.low %v683_v11, %v684_v44  ;;  %v2094_v28 = vcombine.low %v2264_v59, %v2265_v25  ;;  %v2270_v11 = vld [vmem:[%s2457_s30 + $0x18] sm:$0xf]  ;;  %v2271_v44 = vld [vmem:[%s2457_s30 + $0x1c] sm:$0xf] }
 0x18b   : > { %v1340_v1 = vpop.permute.xlu0 %1339  ;;  %v1342_v3 = vpop.permute.xlu1 %1341 }
 0x18c   : > { %v1377_v13 = vmul.bf16 %v1340_v1, %v3693_v32  ;;  %v1378_v53 = vmul.bf16 %v1342_v3, %v2837_v33 }
 0x18d   : > { %876 = vrot.lane.b32.xlu0 %v2039_v29, %s2364_s8  ;;  %1022 = vrot.lane.b32.xlu1 %v2047_v19, %s2369_s26 }
 0x18e   : > { %v2071_v50 = vcombine.low %v1377_v13, %v1378_v53  ;;  %v2097_v13 = vcombine.low %v2270_v11, %v2271_v44  ;;  %v2272_v53 = vld [vmem:[%s2457_s30 + $0x20] sm:$0xf] }
 0x18f   : > { %v879_v41 = vpop.permute.xlu0 %878  ;;  %v867_v42 = vpop.permute.xlu1 %866 }
 0x190   : > { %905 = vst.msk [vmem:[#allocation2 + $0x68] sm:$0xff] %vm892_vm2, %v879_v41  ;;  %893 = vst.msk [vmem:[#allocation2 + $0x8] sm:$0xff] %vm892_vm2, %v867_v42 }
 0x191   : > { %465 = vrot.lane.b32.xlu0 %v2015_v2, %s2370_s27  ;;  %1159 = vrot.lane.b32.xlu1 %v2055_v63, %s2371_s4  ;;  %v2269_v2 = vld [vmem:[%s2457_s30 + $0x14] sm:$0xf]  ;;  %s2118_s4 = sshll.u32 %s2350_s15, 11 }
 0x192   : > { %v2096_v63 = vcombine.low %v2268_v56, %v2269_v2  ;;  %s3547_s9 = scalar_lea.hbm %s3604_s3, %s2118_s4 }
 0x193   : > { %v1025_v46 = vpop.permute.xlu0 %1024  ;;  %v468_v26 = vpop.permute.xlu1 %467 }
 0x194   : > { %1043 = vst.msk [vmem:[#allocation2 + $0x68] sm:$0xff] %vm1036_vm3, %v1025_v46  ;;  %v2273_v46 = vld [vmem:[%s2457_s30 + $0x24] sm:$0xf] }
 0x195   : > { %486 = vst.msk [vmem:[#allocation2 + $0x60] sm:$0xff] %vm479_vm4, %v468_v26  ;;  %602 = vrot.lane.b32.xlu0 %v2023_v60, %s2372_s7  ;;  %1296 = vrot.lane.b32.xlu1 %v2063_v15, %s2373_s18  ;;  %v2098_v26 = vcombine.low %v2272_v53, %v2273_v46  ;;  %s2375_s18 = smov [#allocation3]  }
 0x197   : > { %v1013_v36 = vpop.permute.xlu0 %1012  ;;  %v1162_v27 = vpop.permute.xlu1 %1161 }
 0x198   : > { %1037 = vst.msk [vmem:[#allocation2 + $0x8] sm:$0xff] %vm1036_vm3, %v1013_v36 }
 0x199   : > { %1180 = vst.msk [vmem:[#allocation2 + $0x68] sm:$0xff] %vm1173_vm5, %v1162_v27  ;;  %739 = vrot.lane.b32.xlu0 %v2031_v61, %s2367_s11  ;;  %1433 = vrot.lane.b32.xlu1 %v2071_v50, %s2374_s19  ;;  %s2284_s19 = sshll.u32 %s2375_s18, 4  ;;  %s2285_s19 = int_to_ptr.vmem [resolvable:$false] %s2284_s19 }
 0x19a   : > { %s2286_s21 = scalar_lea.vmem %s2285_s19, 4096 }
 0x19b   : > { %v456_v33 = vpop.permute.xlu0 %455  ;;  %v605_v0 = vpop.permute.xlu1 %604 }
 0x19c   : > { %480 = vst.msk [vmem:[#allocation2] sm:$0xff] %vm479_vm4, %v456_v33 }
 0x19d   : > { %623 = vst.msk [vmem:[#allocation2 + $0x60] sm:$0xff] %vm616_vm6, %v605_v0 }
 0x19f   : > { %v1150_v47 = vpop.permute.xlu0 %1149  ;;  %v1299_v8 = vpop.permute.xlu1 %1298 }
 0x1a0   : > { %1174 = vst.msk [vmem:[#allocation2 + $0x8] sm:$0xff] %vm1173_vm5, %v1150_v47  ;;  %v2274_v47 = vld [vmem:[%s2457_s30 + $0x28] sm:$0xf] }
 0x1a1   : > { %1317 = vst.msk [vmem:[#allocation2 + $0x68] sm:$0xff] %vm1310_vm7, %v1299_v8  ;;  %v2275_v8 = vld [vmem:[%s2457_s30 + $0x2c] sm:$0xf] }
 0x1a3   : > { %v593_v10 = vpop.permute.xlu0 %592  ;;  %v742_v48 = vpop.permute.xlu1 %741 }
 0x1a4   : > { %617 = vst.msk [vmem:[#allocation2] sm:$0xff] %vm616_vm6, %v593_v10  ;;  %v2099_v10 = vcombine.low %v2274_v47, %v2275_v8 }
 0x1a5   : > { %760 = vst.msk [vmem:[#allocation2 + $0x60] sm:$0xff] %vm753_vm8, %v742_v48  ;;  %v2276_v48 = vld [vmem:[%s2457_s30 + $0x30] sm:$0xf] }
 0x1a6   : > { %904 = vst.msk [vmem:[#allocation2 + $0x60] sm:$0xff] %vm890_vm9, %v879_v41 }
 0x1a7   : > { %v1287_v49 = vpop.permute.xlu0 %1286  ;;  %v1436_v6 = vpop.permute.xlu1 %1435 }
 0x1a8   : > { %1311 = vst.msk [vmem:[#allocation2 + $0x8] sm:$0xff] %vm1310_vm7, %v1287_v49  ;;  %v2277_v49 = vld [vmem:[%s2457_s30 + $0x34] sm:$0xf] }
 0x1a9   : > { %1454 = vst.msk [vmem:[#allocation2 + $0x68] sm:$0xff] %vm1447_vm10, %v1436_v6  ;;  %v2100_v6 = vcombine.low %v2276_v48, %v2277_v49 }
 0x1ab   : > { %v730_v35 = vpop.permute.xlu0 %729  ;;  %v1424_v55 = vpop.permute.xlu1 %1423 }
 0x1ac   : > { %754 = vst.msk [vmem:[#allocation2] sm:$0xff] %vm753_vm8, %v730_v35 }
 0x1ad   : > { %1448 = vst.msk [vmem:[#allocation2 + $0x8] sm:$0xff] %vm1447_vm10, %v1424_v55  ;;  %v1468_v17 = vld [vmem:[#allocation2 + $0x60] sm:$0xff] }
 0x1ae   : > { %891 = vst.msk [vmem:[#allocation2] sm:$0xff] %vm890_vm9, %v867_v42 }
 0x1af   : > { %v881_v5 = vpop.permute.xlu0 %880  ;;  %v869_v9 = vpop.permute.xlu1 %868 }
 0x1b0   : > { %v1469_v40 = vld [vmem:[#allocation2 + $0x68] sm:$0xff]  ;;  %907 = vst.msk [vmem:[#allocation2 + $0x78] sm:$0xff] %vm892_vm2, %v881_v5  ;;  %895 = vst.msk [vmem:[#allocation2 + $0x18] sm:$0xff] %vm892_vm2, %v869_v9 }
 0x1b1   : > { %2092 = vmatprep.mubr.msk.bf16.mxu1 %vm1564_vm11, %v1469_v40  ;;  %v2278_v40 = vld [vmem:[%s2457_s30 + $0x38] sm:$0xf] }
 0x1b2   : > { %1674 = vmatmul.mubr.bf16.vlgmr.msra.gmra.mrb[0].mxu1 %v1468_v17 }
 0x1b3   : > { %2131 = vmatpush3.bf16.msra.mxu1 %v3175_v14  ;;  %v1027_v32 = vpop.permute.xlu0 %1026  ;;  %v470_v38 = vpop.permute.xlu1 %469  ;;  %v1754_v14 = vsel %vm1589_vm1, %v2263_v43, 0 }
 0x1b4   : > { %v1457_v58 = vld [vmem:[#allocation2 + $0x8] sm:$0xff]  ;;  %2132 = vmatprep.subr.bf16.mxu1 %v2262_v12  ;;  %1044 = vst.msk [vmem:[#allocation2 + $0x78] sm:$0xff] %vm1036_vm3, %v1027_v32 }
 0x1b5   : > { %487 = vst.msk [vmem:[#allocation2 + $0x70] sm:$0xff] %vm479_vm4, %v470_v38  ;;  %2086 = vmatprep.mubr.msk.bf16.mxu0 %vm1564_vm11, %v1457_v58  ;;  %v1456_v45 = vld [vmem:[#allocation2] sm:$0xff] }
 0x1b6   : > { %1626 = vmatmul.mubr.bf16.vlgmr.msra.gmra.mrb[0].mxu0 %v1456_v45 }
 0x1b7   : > { %2133 = vmatpush3.bf16.msra.mxu1 %v2262_v12  ;;  %v1015_v52 = vpop.permute.xlu0 %1014  ;;  %v1164_v7 = vpop.permute.xlu1 %1163  ;;  %v2279_v12 = vld [vmem:[%s2457_s30 + $0x3c] sm:$0xf]  ;;  %s216_s30 = sand.u32 1, %s2342_s13  }
 0x1b8   : > { %2176 = vmatprep.subr.msk.bf16.mxu1 %vm1589_vm1, %v2263_v43  ;;  %1038 = vst.msk [vmem:[#allocation2 + $0x18] sm:$0xff] %vm1036_vm3, %v1015_v52  ;;  %v2101_v17 = vcombine.low %v2278_v40, %v2279_v12  ;;  %s1999_s28 = sshll.u32 %s216_s30, 7  ;;  %s3555_s15 = scalar_lea.sflag [#allocation4], %s216_s30 }
 0x1b9   : > { %1181 = vst.msk [vmem:[#allocation2 + $0x78] sm:$0xff] %vm1173_vm5, %v1164_v7  ;;  %s3526_s29 = scalar_lea.vmem [#allocation3], %s1999_s28 }
 0x1ba   : > { %s1884_s5 = sshll.u32 %s3526_s29, 4  ;;  %s3549_s5 = int_to_ptr.vmem [resolvable:$true] %s1884_s5 }
 0x1bb   : > { %2135 = vmatpush3.bf16.msra.mxu1 %v1754_v14  ;;  %v458_v20 = vpop.permute.xlu0 %457  ;;  %v607_v54 = vpop.permute.xlu1 %606  ;;  %s2280_s10 = scalar_lea.vmem %s3549_s5, 2048  ;;  %p2287_p1 = scmp.lt.s32.totalorder %s3549_s5, %s2285_s19 }
 0x1bc   : > { %481 = vst.msk [vmem:[#allocation2 + $0x10] sm:$0xff] %vm479_vm4, %v458_v20  ;;  %p2281_p12 = scmp.ne.s32.totalorder %s3549_s5, %s2280_s10  ;;  %p2288_p2 = scmp.lt.s32.totalorder %s2286_s21, %s2280_s10 }
 0x1bd   : > { %624 = vst.msk [vmem:[#allocation2 + $0x70] sm:$0xff] %vm616_vm6, %v607_v54 }
 0x1be   : > { %p2282_p13 = pnand %p2281_p12, %p2438_p4  ;;  %p2289_p3 = por %p2288_p2, %p2287_p1 }
 0x1bf   : > { %v1152_v21 = vpop.permute.xlu0 %1151  ;;  %v1301_v22 = vpop.permute.xlu1 %1300 }
 0x1c0   : > { %1175 = vst.msk [vmem:[#allocation2 + $0x18] sm:$0xff] %vm1173_vm5, %v1152_v21  ;;  %p2283_p0 = pneg %p2282_p13 }
 0x1c1   : > { %1318 = vst.msk [vmem:[#allocation2 + $0x78] sm:$0xff] %vm1310_vm7, %v1301_v22 }
 0x1c2   : > { %p2290_p5 = pnand %p2289_p3, %p2283_p0 }
 0x1c3   : > { %v595_v23 = vpop.permute.xlu0 %594  ;;  %v744_v16 = vpop.permute.xlu1 %743 }
 0x1c4   : > { %618 = vst.msk [vmem:[#allocation2 + $0x10] sm:$0xff] %vm616_vm6, %v595_v23 }
 0x1c5   : > { %761 = vst.msk [vmem:[#allocation2 + $0x70] sm:$0xff] %vm753_vm8, %v744_v16 }
 0x1c6   : > { %906 = vst.msk [vmem:[#allocation2 + $0x70] sm:$0xff] %vm890_vm9, %v881_v5 }
 0x1c7   : > { %v1289_v30 = vpop.permute.xlu0 %1288  ;;  %v1438_v62 = vpop.permute.xlu1 %1437 }
 0x1c8   : > { %1312 = vst.msk [vmem:[#allocation2 + $0x18] sm:$0xff] %vm1310_vm7, %v1289_v30 }
 0x1c9   : > { %1455 = vst.msk [vmem:[#allocation2 + $0x78] sm:$0xff] %vm1447_vm10, %v1438_v62 }
 0x1cb   : > { %v732_v18 = vpop.permute.xlu0 %731  ;;  %v1426_v24 = vpop.permute.xlu1 %1425 }
 0x1cc   : > { %755 = vst.msk [vmem:[#allocation2 + $0x10] sm:$0xff] %vm753_vm8, %v732_v18 }
 0x1cd   : > { %1449 = vst.msk [vmem:[#allocation2 + $0x18] sm:$0xff] %vm1447_vm10, %v1426_v24  ;;  %v1470_v39 = vld [vmem:[#allocation2 + $0x70] sm:$0xff] }
 0x1ce   : > { %894 = vst.msk [vmem:[#allocation2 + $0x10] sm:$0xff] %vm890_vm9, %v869_v9 }
 0x1cf   : > { %v871_v29 = vpop.permute.xlu0 %870  ;;  %v1017_v19 = vpop.permute.xlu1 %1016 }
 0x1d0   : > { %v1471_v57 = vld [vmem:[#allocation2 + $0x78] sm:$0xff]  ;;  %897 = vst.msk [vmem:[#allocation2 + $0x28] sm:$0xff] %vm892_vm2, %v871_v29 }
 0x1d1   : > { %2093 = vmatprep.mubr.msk.bf16.mxu1 %vm1564_vm11, %v1471_v57  ;;  %1039 = vst.msk [vmem:[#allocation2 + $0x28] sm:$0xff] %vm1036_vm3, %v1017_v19 }
 0x1d2   : > { %1682 = vmatmul.mubr.bf16.gmra.mrb[4].mxu1 %v1470_v39 }
 0x1d3   : > { %2136 = vmatprep.mubr.msk.bf16.mxu1 %vm326_vm0, %v2094_v28  ;;  %v460_v51 = vpop.permute.xlu0 %459  ;;  %v1154_v4 = vpop.permute.xlu1 %1153 }
 0x1d4   : > { %v1459_v1 = vld [vmem:[#allocation2 + $0x18] sm:$0xff]  ;;  %482 = vst.msk [vmem:[#allocation2 + $0x20] sm:$0xff] %vm479_vm4, %v460_v51 }
 0x1d5   : > { %1176 = vst.msk [vmem:[#allocation2 + $0x28] sm:$0xff] %vm1173_vm5, %v1154_v4  ;;  %2087 = vmatprep.mubr.msk.bf16.mxu0 %vm1564_vm11, %v1459_v1  ;;  %v1458_v3 = vld [vmem:[#allocation2 + $0x10] sm:$0xff] }
 0x1d6   : > { %1634 = vmatmul.mubr.bf16.gmra.mrb[4].mxu0 %v1458_v3 }
 0x1d7   : > { %v597_v41 = vpop.permute.xlu0 %596  ;;  %v1291_v42 = vpop.permute.xlu1 %1290 }
 0x1d8   : > { %619 = vst.msk [vmem:[#allocation2 + $0x20] sm:$0xff] %vm616_vm6, %v597_v41 }
 0x1d9   : > { %1313 = vst.msk [vmem:[#allocation2 + $0x28] sm:$0xff] %vm1310_vm7, %v1291_v42 }
 0x1da   : > { %2137 = vmatmul.mubr.msk.bf16.vlgmr.msra.gmra.mrb[8].mxu1 %vm326_vm0, %v2095_v37 }
 0x1db   : > { %2140 = vmatprep.mubr.msk.bf16.mxu1 %vm326_vm0, %v2096_v63  ;;  %v734_v60 = vpop.permute.xlu0 %733  ;;  %v1428_v15 = vpop.permute.xlu1 %1427 }
 0x1dc   : > { %756 = vst.msk [vmem:[#allocation2 + $0x20] sm:$0xff] %vm753_vm8, %v734_v60 }
 0x1dd   : > { %1450 = vst.msk [vmem:[#allocation2 + $0x28] sm:$0xff] %vm1447_vm10, %v1428_v15 }
 0x1de   : > { %896 = vst.msk [vmem:[#allocation2 + $0x20] sm:$0xff] %vm890_vm9, %v871_v29 }
 0x1df   : > { %v873_v61 = vpop.permute.xlu0 %872  ;;  %v1019_v50 = vpop.permute.xlu1 %1018 }
 0x1e0   : > { %899 = vst.msk [vmem:[#allocation2 + $0x38] sm:$0xff] %vm892_vm2, %v873_v61 }
 0x1e1   : > { %1040 = vst.msk [vmem:[#allocation2 + $0x38] sm:$0xff] %vm1036_vm3, %v1019_v50 }
 0x1e2   : > { %2141 = vmatmul.mubr.msk.bf16.gmra.mrb[12].mxu1 %vm326_vm0, %v2097_v13 }
 0x1e3   : > { %2144 = vmatprep.mubr.msk.bf16.mxu1 %vm326_vm0, %v2098_v26  ;;  %v462_v36 = vpop.permute.xlu0 %461  ;;  %v1156_v27 = vpop.permute.xlu1 %1155 }
 0x1e4   : > { %v1461_v33 = vld [vmem:[#allocation2 + $0x28] sm:$0xff]  ;;  %483 = vst.msk [vmem:[#allocation2 + $0x30] sm:$0xff] %vm479_vm4, %v462_v36 }
 0x1e5   : > { %1177 = vst.msk [vmem:[#allocation2 + $0x38] sm:$0xff] %vm1173_vm5, %v1156_v27  ;;  %2088 = vmatprep.mubr.msk.bf16.mxu0 %vm1564_vm11, %v1461_v33  ;;  %v1460_v0 = vld [vmem:[#allocation2 + $0x20] sm:$0xff] }
 0x1e6   : > { %1642 = vmatmul.mubr.bf16.gmra.mrb[8].mxu0 %v1460_v0 }
 0x1e7   : > { %v599_v35 = vpop.permute.xlu0 %598  ;;  %v1293_v55 = vpop.permute.xlu1 %1292 }
 0x1e8   : > { %620 = vst.msk [vmem:[#allocation2 + $0x30] sm:$0xff] %vm616_vm6, %v599_v35 }
 0x1e9   : > { %1314 = vst.msk [vmem:[#allocation2 + $0x38] sm:$0xff] %vm1310_vm7, %v1293_v55 }
 0x1ea   : > { %2145 = vmatmul.mubr.msk.bf16.gmra.mrb[16].mxu1 %vm326_vm0, %v2099_v10 }
 0x1eb   : > { %2148 = vmatprep.mubr.msk.bf16.mxu1 %vm326_vm0, %v2100_v6  ;;  %v736_v5 = vpop.permute.xlu0 %735  ;;  %v1430_v9 = vpop.permute.xlu1 %1429 }
 0x1ec   : > { %757 = vst.msk [vmem:[#allocation2 + $0x30] sm:$0xff] %vm753_vm8, %v736_v5 }
 0x1ed   : > { %1451 = vst.msk [vmem:[#allocation2 + $0x38] sm:$0xff] %vm1447_vm10, %v1430_v9 }
 0x1ee   : > { %898 = vst.msk [vmem:[#allocation2 + $0x30] sm:$0xff] %vm890_vm9, %v873_v61 }
 0x1ef   : > { %v875_v32 = vpop.permute.xlu0 %874  ;;  %v1021_v38 = vpop.permute.xlu1 %1020 }
 0x1f0   : > { %901 = vst.msk [vmem:[#allocation2 + $0x48] sm:$0xff] %vm892_vm2, %v875_v32 }
 0x1f1   : > { %1041 = vst.msk [vmem:[#allocation2 + $0x48] sm:$0xff] %vm1036_vm3, %v1021_v38 }
 0x1f2   : > { %2149 = vmatmul.mubr.msk.bf16.gmra.mrb[20].mxu1 %vm326_vm0, %v2101_v17 }
 0x1f3   : > { %v464_v58 = vpop.permute.xlu0 %463  ;;  %v1158_v43 = vpop.permute.xlu1 %1157 }
 0x1f4   : > { %v1463_v45 = vld [vmem:[#allocation2 + $0x38] sm:$0xff]  ;;  %484 = vst.msk [vmem:[#allocation2 + $0x40] sm:$0xff] %vm479_vm4, %v464_v58 }
 0x1f5   : > { %1178 = vst.msk [vmem:[#allocation2 + $0x48] sm:$0xff] %vm1173_vm5, %v1158_v43  ;;  %2089 = vmatprep.mubr.msk.bf16.mxu0 %vm1564_vm11, %v1463_v45  ;;  %v1462_v52 = vld [vmem:[#allocation2 + $0x30] sm:$0xff] }
 0x1f6   : > { %1650 = vmatmul.mubr.bf16.gmra.mrb[12].mxu0 %v1462_v52 }
 0x1f7   : > { %v601_v7 = vpop.permute.xlu0 %600  ;;  %v1295_v14 = vpop.permute.xlu1 %1294 }
 0x1f8   : > { %621 = vst.msk [vmem:[#allocation2 + $0x40] sm:$0xff] %vm616_vm6, %v601_v7 }
 0x1f9   : > { %1315 = vst.msk [vmem:[#allocation2 + $0x48] sm:$0xff] %vm1310_vm7, %v1295_v14 }
 0x1fb   : > { %v738_v20 = vpop.permute.xlu0 %737  ;;  %v1432_v54 = vpop.permute.xlu1 %1431 }
 0x1fc   : > { %758 = vst.msk [vmem:[#allocation2 + $0x40] sm:$0xff] %vm753_vm8, %v738_v20 }
 0x1fd   : > { %1452 = vst.msk [vmem:[#allocation2 + $0x48] sm:$0xff] %vm1447_vm10, %v1432_v54 }
 0x1fe   : > { %900 = vst.msk [vmem:[#allocation2 + $0x40] sm:$0xff] %vm890_vm9, %v875_v32 }
 0x1ff   : > { %v877_v21 = vpop.permute.xlu0 %876  ;;  %v1023_v22 = vpop.permute.xlu1 %1022 }
 0x200   : > { %903 = vst.msk [vmem:[#allocation2 + $0x58] sm:$0xff] %vm892_vm2, %v877_v21 }
 0x201   : > { %1042 = vst.msk [vmem:[#allocation2 + $0x58] sm:$0xff] %vm1036_vm3, %v1023_v22 }
 0x203   : > { %v466_v23 = vpop.permute.xlu0 %465  ;;  %v1160_v16 = vpop.permute.xlu1 %1159 }
 0x204   : > { %v1465_v30 = vld [vmem:[#allocation2 + $0x48] sm:$0xff]  ;;  %485 = vst.msk [vmem:[#allocation2 + $0x50] sm:$0xff] %vm479_vm4, %v466_v23 }
 0x205   : > { %1179 = vst.msk [vmem:[#allocation2 + $0x58] sm:$0xff] %vm1173_vm5, %v1160_v16  ;;  %2090 = vmatprep.mubr.msk.bf16.mxu0 %vm1564_vm11, %v1465_v30  ;;  %v1464_v62 = vld [vmem:[#allocation2 + $0x40] sm:$0xff] }
 0x206   : > { %1658 = vmatmul.mubr.bf16.gmra.mrb[16].mxu0 %v1464_v62 }
 0x207   : > { %v603_v18 = vpop.permute.xlu0 %602  ;;  %v1297_v24 = vpop.permute.xlu1 %1296 }
 0x208   : > { %622 = vst.msk [vmem:[#allocation2 + $0x50] sm:$0xff] %vm616_vm6, %v603_v18 }
 0x209   : > { %1316 = vst.msk [vmem:[#allocation2 + $0x58] sm:$0xff] %vm1310_vm7, %v1297_v24 }
 0x20b   : > { %v740_v59 = vpop.permute.xlu0 %739  ;;  %v1434_v25 = vpop.permute.xlu1 %1433 }
 0x20c   : > { %759 = vst.msk [vmem:[#allocation2 + $0x50] sm:$0xff] %vm753_vm8, %v740_v59 }
 0x20d   : > { %1453 = vst.msk [vmem:[#allocation2 + $0x58] sm:$0xff] %vm1447_vm10, %v1434_v25 }
 0x20e   : > { %902 = vst.msk [vmem:[#allocation2 + $0x50] sm:$0xff] %vm890_vm9, %v877_v21 }
 0x214   : > { %v1467_v28 = vld [vmem:[#allocation2 + $0x58] sm:$0xff] }
 0x215   : > { %2091 = vmatprep.mubr.msk.bf16.mxu0 %vm1564_vm11, %v1467_v28  ;;  %v1466_v29 = vld [vmem:[#allocation2 + $0x50] sm:$0xff] }
 0x216   : > { %1666 = vmatmul.mubr.bf16.gmra.mrb[20].mxu0 %v1466_v29 }
 0x285   : > { %v1675_v19 = vpop.f32.mrb[0].mxu1 }
 0x286   : > { %v1677_v57 = vpop.f32.mrb[1].mxu1 }
 0x287   : > { %v1678_v39 = vpop.f32.mrb[2].mxu1 }
 0x288   : > { %v1680_v51 = vpop.f32.mrb[3].mxu1 }
 0x289   : > { %v1627_v4 = vpop.f32.mrb[0].mxu0 }
 0x28a   : > { %v1629_v1 = vpop.f32.mrb[1].mxu0 }
 0x28b   : > { %v1630_v3 = vpop.f32.mrb[2].mxu0 }
 0x28c   : > { %v1632_v31 = vpop.f32.mrb[3].mxu0 }
 0x2a5   : > { %v1683_v34 = vpop.f32.mrb[4].mxu1 }
 0x2a6   : > { %v1685_v37 = vpop.f32.mrb[5].mxu1 }
 0x2a7   : > { %v1686_v56 = vpop.f32.mrb[6].mxu1 }
 0x2a8   : > { %v1688_v2 = vpop.f32.mrb[7].mxu1 }
 0x2a9   : > { %v1635_v63 = vpop.f32.mrb[4].mxu0 }
 0x2aa   : > { %v1637_v41 = vpop.f32.mrb[5].mxu0 }
 0x2ab   : > { %v1638_v42 = vpop.f32.mrb[6].mxu0 }
 0x2ac   : > { %v1640_v60 = vpop.f32.mrb[7].mxu0 }
 0x2ad   : > { %v2138_v15 = vpop.f32.mrb[8].mxu1 }
 0x2ae   : > { %v1799_v11 = vadd.f32 %v2138_v15, %v1635_v63  ;;  %v1790_v44 = vpop.f32.mrb[9].mxu1 }
 0x2af   : > { %v1791_v13 = vadd.f32 %v1790_v44, %v1627_v4  ;;  %v2139_v53 = vpop.f32.mrb[10].mxu1 }
 0x2b0   : > { %1855 = vst [vmem:[%s3526_s29 + $0x10] sm:$0xff] %v1799_v11  ;;  %v1802_v46 = vadd.f32 %v2139_v53, %v1638_v42  ;;  %v1793_v26 = vpop.f32.mrb[11].mxu1 }
 0x2b1   : > { %1853 = vst [vmem:[%s3526_s29] sm:$0xff] %v1791_v13  ;;  %v1794_v61 = vadd.f32 %v1793_v26, %v1630_v3 }
 0x2b2   : > { %1856 = vst [vmem:[%s3526_s29 + $0x18] sm:$0xff] %v1802_v46 }
 0x2b3   : > { %1854 = vst [vmem:[%s3526_s29 + $0x8] sm:$0xff] %v1794_v61 }
 0x2b5   : > { %v2142_v50 = vpop.f32.mrb[12].mxu1 }
 0x2b6   : > { %v1806_v36 = vpop.f32.mrb[13].mxu1 }
 0x2b7   : > { %v2143_v27 = vpop.f32.mrb[14].mxu1 }
 0x2b8   : > { %v1809_v33 = vpop.f32.mrb[15].mxu1 }
 0x2b9   : > { %v1643_v0 = vpop.f32.mrb[8].mxu0 }
 0x2ba   : > { %v1807_v47 = vadd.f32 %v1806_v36, %v1643_v0  ;;  %v1645_v8 = vpop.f32.mrb[9].mxu0 }
 0x2bb   : > { %v1646_v10 = vpop.f32.mrb[10].mxu0 }
 0x2bc   : > { %1857 = vst [vmem:[%s3526_s29 + $0x20] sm:$0xff] %v1807_v47  ;;  %v1810_v48 = vadd.f32 %v1809_v33, %v1646_v10  ;;  %v1648_v49 = vpop.f32.mrb[11].mxu0 }
 0x2bd   : > { %v2146_v6 = vpop.f32.mrb[16].mxu1 }
 0x2be   : > { %1858 = vst [vmem:[%s3526_s29 + $0x28] sm:$0xff] %v1810_v48  ;;  %v1822_v35 = vpop.f32.mrb[17].mxu1 }
 0x2bf   : > { %v2147_v55 = vpop.f32.mrb[18].mxu1 }
 0x2c0   : > { %v1825_v5 = vpop.f32.mrb[19].mxu1 }
 0x2c5   : > { %v2150_v9 = vpop.f32.mrb[20].mxu1 }
 0x2c6   : > { %v1847_v40 = vadd.f32 %v2150_v9, %v1683_v34  ;;  %v1838_v12 = vpop.f32.mrb[21].mxu1 }
 0x2c7   : > { %v1839_v17 = vadd.f32 %v1838_v12, %v1675_v19  ;;  %v2151_v32 = vpop.f32.mrb[22].mxu1 }
 0x2c8   : > { %1867 = vst [vmem:[%s3526_s29 + $0x70] sm:$0xff] %v1847_v40  ;;  %v1850_v38 = vadd.f32 %v2151_v32, %v1686_v56  ;;  %v1841_v58 = vpop.f32.mrb[23].mxu1 }
 0x2c9   : > { %1865 = vst [vmem:[%s3526_s29 + $0x60] sm:$0xff] %v1839_v17  ;;  %v1842_v43 = vadd.f32 %v1841_v58, %v1678_v39  ;;  %v1651_v45 = vpop.f32.mrb[12].mxu0 }
 0x2ca   : > { %1868 = vst [vmem:[%s3526_s29 + $0x78] sm:$0xff] %v1850_v38  ;;  %v1815_v52 = vadd.f32 %v2142_v50, %v1651_v45  ;;  %v1653_v7 = vpop.f32.mrb[13].mxu0 }
 0x2cb   : > { %1866 = vst [vmem:[%s3526_s29 + $0x68] sm:$0xff] %v1842_v43  ;;  %v1654_v14 = vpop.f32.mrb[14].mxu0 }
 0x2cc   : > { %1859 = vst [vmem:[%s3526_s29 + $0x30] sm:$0xff] %v1815_v52  ;;  %v1818_v20 = vadd.f32 %v2143_v27, %v1654_v14  ;;  %v1656_v54 = vpop.f32.mrb[15].mxu0 }
 0x2ce   : > { %1860 = vst [vmem:[%s3526_s29 + $0x38] sm:$0xff] %v1818_v20 }
 0x2d9   : > { %v1659_v21 = vpop.f32.mrb[16].mxu0 }
 0x2da   : > { %v1823_v22 = vadd.f32 %v1822_v35, %v1659_v21  ;;  %v1661_v23 = vpop.f32.mrb[17].mxu0 }
 0x2db   : > { %v1662_v16 = vpop.f32.mrb[18].mxu0 }
 0x2dc   : > { %1861 = vst [vmem:[%s3526_s29 + $0x40] sm:$0xff] %v1823_v22  ;;  %v1826_v30 = vadd.f32 %v1825_v5, %v1662_v16  ;;  %v1664_v62 = vpop.f32.mrb[19].mxu0 }
 0x2de   : > { %1862 = vst [vmem:[%s3526_s29 + $0x48] sm:$0xff] %v1826_v30 }
 0x2e9   : > { %v1667_v18 = vpop.f32.mrb[20].mxu0 }
 0x2ea   : > { %v1831_v24 = vadd.f32 %v2146_v6, %v1667_v18  ;;  %v1669_v59 = vpop.f32.mrb[21].mxu0 }
 0x2eb   : > { %v1670_v25 = vpop.f32.mrb[22].mxu0 }
 0x2ec   : > { %1863 = vst [vmem:[%s3526_s29 + $0x50] sm:$0xff] %v1831_v24  ;;  %v1834_v28 = vadd.f32 %v2147_v55, %v1670_v25  ;;  %v1672_v29 = vpop.f32.mrb[23].mxu0 }
 0x2ee   : > { %1864 = vst [vmem:[%s3526_s29 + $0x58] sm:$0xff] %v1834_v28 }
 0x2ef   : > { %2293 = shalt.err (!%p2290_p5)
}
 0x2f0   : > { %s2294_s23 = scalar_lea.hbm %s3547_s9, 2048  ;;  %s2298_s26 = scalar_lea.hbm %s3604_s3, 8192 }
 0x2f1   : > { %p2295_p6 = scmp.ne.s32.totalorder %s3547_s9, %s2294_s23  ;;  %p2299_p10 = scmp.lt.u32.totalorder %s3547_s9, %s3604_s3 }
 0x2f2   : > { %p2300_p11 = scmp.lt.u32.totalorder %s2298_s26, %s2294_s23  ;;  %p2302_p13 = scmp.lt.u32.totalorder %s2294_s23, %s3547_s9 }
 0x2f3   : > { %p2296_p7 = pnand %p2295_p6, %p2438_p4 }
 0x2f4   : > { %p2301_p12 = por %p2300_p11, %p2299_p10 }
 0x2f5   : > { %p2297_p9 = pneg %p2296_p7 }
 0x2f6   : > { %p2303_p0 = por %p2302_p13, %p2301_p12 }
 0x2f8   : > { %p2304_p1 = pnand %p2303_p0, %p2297_p9 }
 0x2fa   : > { %2307 = shalt.err (!%p2304_p1)
}
 0x2fb   : > { %s2376_s28 = smov 128   ;;  %s2377_s29 = smov 8  }
 0x2fc   : > { %2177 = dma.vmem_to_hbm [thread:$0]  (%p2438_p4), %s3549_s5, 2048, %s3547_s9, %s3555_s15, %s2376_s28, %s2376_s28, %s2377_s29  }
 0x2fd PF: > { %p2183_p2 = scmp.ge.s32.totalorder %s2358_s17, 2  ;;  %s1899_s4 = sand.u32 1, %s2338_s12  }
 0x2fe   : > { %s1900_s6 = scalar_lea.sflag [#allocation4], %s1899_s4 }
 0x2ff   : > { %p2180_p3 = pnand %p2183_p2, %p2445_p8 }
 0x301   : > { %2333 = dma.done.wait (!%p2180_p3), %s1900_s6, 2048  }
 0x302   : > { %2335 = vsyncadd (!%p2180_p3), %s1900_s6, 4294965248  ;;  %s16_s17 = sadd.s32 1, %s2358_s17   ;;  %s3694_s12 = smov %s2342_s13 }
 0x303   : > { %p13_p5 = scmp.ge.s32.totalorder %s16_s17, 6   ;;  %s3695_s13 = smov %s2346_s14 }
 0x304   : > { %s3696_s14 = smov %s2451_s25  ;;  %s3697_s15 = smov %s2354_s16 }
 0x305   : > { %s3698_s16 = smov %s3700_s20  ;;  %15 = sbr.rel (!%p13_p5) target bundleno = 4 (0x4), region = 73 }
 0x30c   :  { %1905 = vsyncpa [#allocation4], 1 }
 0x30d   :  { %1907 = vsyncpa [#allocation4 + $0x1], 1 }

</bundles_post_ra>
